<compile_context>
chip_gen: v5e
topology: v5e:2x2
jax: 0.10.0
libtpu: 0.0.40
codegen_flags: <defaults>
</compile_context>

<pallas_src>
import math

import jax
import jax.numpy as jnp
from jax.experimental import pallas as pl
from jax.experimental.pallas import tpu as pltpu

# ----------------------------- small ViT config ------------------------------
B     = 2                      # batch
C     = 3                      # RGB channels
IMG   = 16                     # image_res (scaled down from 224)
P     = 8                      # patch size (scaled down from 16)
N     = (IMG // P) ** 2        # number of patches = 4
S     = N + 1                  # sequence length incl. CLS = 5
BS    = B * S                  # fused token rows = 10
CPP   = C * P * P              # flattened patch = 192
D     = 32                     # hidden_size
H     = 4                      # attention heads
DH    = D // H                 # head dim = 8
MLP   = 64                     # MLP hidden dim
DEPTH = 2                      # transformer blocks
EPS   = 1e-6                   # timm ViT LayerNorm eps
NUM_CLASSES = 2

_F32  = jnp.float32
_BF16 = jnp.bfloat16
_ATTN_SCALE = 1.0 / math.sqrt(DH)
_INV_SQRT2  = 1.0 / math.sqrt(2.0)

# ---------------- packed f32 "misc" slab row layout (one operand) -------------
ROWS_PER_DEPTH = 8             # ln1_g, ln1_b, bqkv, bproj, ln2_g, ln2_b, b1, b2
R_LN1G, R_LN1B, R_BQKV, R_BPROJ, R_LN2G, R_LN2B, R_B1, R_B2 = range(ROWS_PER_DEPTH)
G_ADD     = DEPTH * ROWS_PER_DEPTH       # fused cls/pos/patch-bias add term (BS rows)
G_NORM_G  = G_ADD + BS
G_NORM_B  = G_NORM_G + 1
G_HEADW   = G_NORM_B + 1                 # head weight, stored transposed (NUM_CLASSES rows)
G_HEADB   = G_HEADW + NUM_CLASSES
G_MASK    = G_HEADB + 1                  # block-diagonal attention mask (BS rows)
MISC_ROWS = G_MASK + BS
MISC_W    = 3 * D                        # 96 lanes (>= 3*D, MLP, D, BS)

# column layout of the per-depth block-weight slab: [qkv | proj | fc1]
COL_QKV  = 0
COL_PROJ = 3 * D
COL_FC1  = 4 * D
WBLK_W   = 4 * D + MLP                   # 192


# --------------------------- in-kernel math helpers ---------------------------

def _erf_f32(z):
    # f32-accurate erf (Abramowitz & Stegun 7.1.26, |err| <= 1.5e-7), built from exp
    # only so it lowers cleanly in Mosaic (stand-in for lax.erf inside the kernel).
    t = 1.0 / (1.0 + 0.3275911 * jnp.abs(z))
    poly = ((((1.061405429 * t - 1.453152027) * t + 1.421413741) * t
             - 0.284496736) * t + 0.254829592) * t
    e = 1.0 - poly * jnp.exp(-(z * z))
    return jnp.where(z >= 0.0, e, -e)


def _gelu_exact(z):
    # nn.GELU (exact erf form), evaluated in f32; exp uses the otherwise-idle EUP slot.
    return 0.5 * z * (1.0 + _erf_f32(z * _INV_SQRT2))


def _layer_norm(z, g, b):
    mu = jnp.mean(z, axis=-1, keepdims=True)
    c = z - mu
    var = jnp.mean(c * c, axis=-1, keepdims=True)
    return c * jax.lax.rsqrt(var + EPS) * g + b


def _mm(a, w_bf16):
    # MXU matmul: bf16 inputs (weights pre-cast on host), f32 accumulation.
    return jnp.dot(a.astype(_BF16), w_bf16, preferred_element_type=_F32)


def _mm_t_f32(a, b):
    # a @ b.T, f32 in / f32 out (tiny head / head-math matmuls; bf16 buys nothing here).
    return jax.lax.dot_general(a, b, dimension_numbers=(((1,), (1,)), ((), ())),
                               preferred_element_type=_F32)


# --------------------------------- the kernel ---------------------------------

def _crisis_vit_kernel(
    labels_ref,                # SMEM [B] int32
    patches_ref,               # VMEM [BS, CPP] bf16   (CLS rows are zero)
    patch_w_ref,               # VMEM [CPP, D] bf16
    wblk_ref,                  # VMEM [DEPTH, D, WBLK_W] bf16   ([qkv | proj | fc1])
    w2_ref,                    # VMEM [DEPTH, MLP, D] bf16
    misc_ref,                  # VMEM [MISC_ROWS, MISC_W] f32   (biases/LN/add/head/mask)
    loss_ref, preds_ref,       # outputs: [1, 1] f32, [B, NUM_CLASSES] f32
):
    def mrow(r, w):
        return misc_ref[r:r + 1, 0:w]            # [1, w] f32 row-vector

    add  = misc_ref[G_ADD:G_ADD + BS, 0:D]       # [BS, D] cls+pos / pos+patch_bias
    mask = misc_ref[G_MASK:G_MASK + BS, 0:BS]    # [BS, BS] 0 / -1e30 block-diag mask

    # ---- patch embedding + CLS token + positional embedding (batch fused) ----
    # zero CLS rows in `patches` => matmul contributes 0 there; `add` supplies cls+pos.
    x = jnp.dot(patches_ref[...], patch_w_ref[...], preferred_element_type=_F32) + add

    # ---- transformer blocks (statically unrolled over DEPTH only) ----
    for d in range(DEPTH):
        base = d * ROWS_PER_DEPTH
        ln1_g = mrow(base + R_LN1G, D)
        ln1_b = mrow(base + R_LN1B, D)
        bqkv  = mrow(base + R_BQKV, 3 * D)
        bproj = mrow(base + R_BPROJ, D)
        ln2_g = mrow(base + R_LN2G, D)
        ln2_b = mrow(base + R_LN2B, D)
        b1    = mrow(base + R_B1, MLP)
        b2    = mrow(base + R_B2, D)

        wd    = wblk_ref[d]                               # [D, WBLK_W] bf16
        wqkv  = wd[:, COL_QKV:COL_QKV + 3 * D]            # [D, 3D]
        wproj = wd[:, COL_PROJ:COL_PROJ + D]              # [D, D]
        w1    = wd[:, COL_FC1:COL_FC1 + MLP]              # [D, MLP]
        w2    = w2_ref[d]                                 # [MLP, D] bf16

        # --- attention sub-block (pre-LN, residual) ---
        y = _layer_norm(x, ln1_g, ln1_b)
        qkv = _mm(y, wqkv) + bqkv                         # [BS, 3D] f32, one MXU push
        heads = []
        for h in range(H):
            q = qkv[:, h * DH:(h + 1) * DH] * _ATTN_SCALE           # [BS, DH]
            k = qkv[:, D + h * DH:D + (h + 1) * DH]                 # [BS, DH]
            v = qkv[:, 2 * D + h * DH:2 * D + (h + 1) * DH]         # [BS, DH]
            s = _mm_t_f32(q, k) + mask                              # [BS, BS] f32
            s = s - jnp.max(s, axis=-1, keepdims=True)
            p = jnp.exp(s)
            p = p * pl.reciprocal(jnp.sum(p, axis=-1, keepdims=True), approx=True)
            heads.append(jnp.dot(p, v, preferred_element_type=_F32))  # [BS, DH] f32
        attn = jnp.concatenate(heads, axis=-1)            # [BS, D] (head concat in lanes)
        x = x + _mm(attn, wproj) + bproj                  # one lane-dense proj matmul

        # --- MLP sub-block (pre-LN, residual, exact-erf GELU) ---
        y = _layer_norm(x, ln2_g, ln2_b)
        hid = _gelu_exact(_mm(y, w1) + b1)                # [BS, MLP]
        x = x + _mm(hid, w2) + b2

    # ---- final LN (CLS rows only), classification head, mean cross-entropy ----
    # TODO(synk): MAE global_pool branch (mean over patch tokens + fc_norm) not wired;
    # this implements the ViT branch (CLS token), matching cls_head = Linear(D, 2).
    norm_g = mrow(G_NORM_G, D)
    norm_b = mrow(G_NORM_B, D)
    head_wT = misc_ref[G_HEADW:G_HEADW + NUM_CLASSES, 0:D]        # [NUM_CLASSES, D] f32
    head_b  = mrow(G_HEADB, NUM_CLASSES)                          # [1, NUM_CLASSES]

    cls_rows = jnp.concatenate([x[b * S:b * S + 1, :] for b in range(B)], axis=0)  # [B, D]
    cls = _layer_norm(cls_rows, norm_g, norm_b)
    logits = _mm_t_f32(cls, head_wT) + head_b                     # [B, NUM_CLASSES] f32
    preds_ref[...] = logits

    cols = jax.lax.broadcasted_iota(jnp.int32, (1, NUM_CLASSES), 1)
    loss_acc = jnp.zeros((1, 1), _F32)
    for b in range(B):
        lg = logits[b:b + 1, :]
        m = jnp.max(lg, axis=-1, keepdims=True)
        lse = jnp.log(jnp.sum(jnp.exp(lg - m), axis=-1, keepdims=True)) + m
        onehot = (cols == labels_ref[b]).astype(_F32)
        loss_acc = loss_acc + (lse - jnp.sum(lg * onehot, axis=-1, keepdims=True))
    loss_ref[...] = loss_acc * (1.0 / B)


# ------------------------------ host-side glue --------------------------------

def _patchify(image):
    """NCHW image -> fused [B*S, CPP] bf16 patches in (c, ph, pw) order, with a zero
    row in each batch's CLS slot so the kernel's single patch-embed matmul covers all
    token rows."""
    x = image.astype(jnp.float32).reshape(B, C, IMG // P, P, IMG // P, P)
    x = x.transpose(0, 2, 4, 1, 3, 5).reshape(B, N, CPP)
    x = jnp.concatenate([jnp.zeros((B, 1, CPP), jnp.float32), x], axis=1)
    return x.reshape(BS, CPP).astype(_BF16)


def init_params(key):
    """Deterministic synthetic init (Linear/Embedding ~ N(0, 0.02), LN = (1, 0)),
    stored in natural (PyTorch-like) shapes."""
    std = 0.02
    ks = jax.random.split(key, 8)
    nrm = lambda k, shape: jax.random.normal(k, shape, jnp.float32) * std
    return {
        # conv-as-matmul weight: [D, C, P, P] flattened over (C, P, P) then transposed.
        "patch_w": nrm(ks[0], (CPP, D)),
        "patch_b": jnp.zeros((D,), jnp.float32),
        "cls_token": nrm(ks[1], (1, 1, D)),
        "pos_embed": nrm(ks[2], (1, S, D)),
        "ln1_g": jnp.ones((DEPTH, D), jnp.float32), "ln1_b": jnp.zeros((DEPTH, D), jnp.float32),
        "qkv_w": nrm(ks[3], (DEPTH, D, 3 * D)),     "qkv_b": jnp.zeros((DEPTH, 3 * D), jnp.float32),
        "proj_w": nrm(ks[4], (DEPTH, D, D)),        "proj_b": jnp.zeros((DEPTH, D), jnp.float32),
        "ln2_g": jnp.ones((DEPTH, D), jnp.float32), "ln2_b": jnp.zeros((DEPTH, D), jnp.float32),
        "fc1_w": nrm(ks[5], (DEPTH, D, MLP)),       "fc1_b": jnp.zeros((DEPTH, MLP), jnp.float32),
        "fc2_w": nrm(ks[6], (DEPTH, MLP, D)),       "fc2_b": jnp.zeros((DEPTH, D), jnp.float32),
        "norm_g": jnp.ones((D,), jnp.float32),      "norm_b": jnp.zeros((D,), jnp.float32),
        "head_w": nrm(ks[7], (D, NUM_CLASSES)),     "head_b": jnp.zeros((NUM_CLASSES,), jnp.float32),
    }


def pack_params(p):
    """One-time host repack into the fused-kernel layout:
       * bf16 weight slabs  : patch_w [CPP,D]; per-depth [D, qkv|proj|fc1]; per-depth fc2
       * one f32 misc slab  : per-depth biases/LN rows, fused cls/pos/patch-bias add term,
                              final LN, transposed head weight + bias, block-diag attn mask.
    A real checkpoint load must honor the same (3, H, DH) qkv column ordering and the
    (C, P, P) patch flattening."""
    f32 = jnp.float32

    wblk = jnp.concatenate([p["qkv_w"], p["proj_w"], p["fc1_w"]], axis=-1).astype(_BF16)

    def row(v):
        v = jnp.asarray(v, f32).reshape(1, -1)
        return jnp.pad(v, ((0, 0), (0, MISC_W - v.shape[1])))

    rows = []
    for d in range(DEPTH):
        rows += [row(p["ln1_g"][d]), row(p["ln1_b"][d]), row(p["qkv_b"][d]),
                 row(p["proj_b"][d]), row(p["ln2_g"][d]), row(p["ln2_b"][d]),
                 row(p["fc1_b"][d]), row(p["fc2_b"][d])]

    add = jnp.concatenate(
        [p["cls_token"][0] + p["pos_embed"][0, 0:1, :],
         p["pos_embed"][0, 1:, :] + p["patch_b"][None, :]], axis=0)        # [S, D]
    add_tiled = jnp.tile(add, (B, 1))                                      # [BS, D]
    rows.append(jnp.pad(add_tiled.astype(f32), ((0, 0), (0, MISC_W - D))))

    rows += [row(p["norm_g"]), row(p["norm_b"])]
    rows.append(jnp.pad(p["head_w"].T.astype(f32), ((0, 0), (0, MISC_W - D))))
    rows.append(row(p["head_b"]))

    rb = jnp.arange(BS) // S
    mask = jnp.where(rb[:, None] == rb[None, :], 0.0, -1e30).astype(f32)   # [BS, BS]
    rows.append(jnp.pad(mask, ((0, 0), (0, MISC_W - BS))))

    misc = jnp.concatenate(rows, axis=0)
    assert misc.shape == (MISC_ROWS, MISC_W)

    return {
        "patch_w": p["patch_w"].astype(_BF16),
        "wblk": wblk,                               # [DEPTH, D, WBLK_W] bf16
        "w2": p["fc2_w"].astype(_BF16),             # [DEPTH, MLP, D]    bf16
        "misc": misc,                               # [MISC_ROWS, MISC_W] f32
    }


@jax.jit
def crisis_vit_pretrain_binary(image, labels, pk):
    """Forward pass of CrisisVitPretrainBinary: (loss, preds).
    train=True path returns loss; eval path returns preds -- both computed here."""
    patches = _patchify(image)
    in_specs = ([pl.BlockSpec(memory_space=pltpu.MemorySpace.SMEM)]        # labels
                + [pl.BlockSpec(memory_space=pltpu.MemorySpace.VMEM)] * 5)
    loss2d, preds = pl.pallas_call(
        _crisis_vit_kernel,
        out_shape=(jax.ShapeDtypeStruct((1, 1), jnp.float32),
                   jax.ShapeDtypeStruct((B, NUM_CLASSES), jnp.float32)),
        in_specs=in_specs,
        out_specs=(pl.BlockSpec(memory_space=pltpu.MemorySpace.VMEM),
                   pl.BlockSpec(memory_space=pltpu.MemorySpace.VMEM)),
    )(labels.astype(jnp.int32), patches,
      pk["patch_w"], pk["wblk"], pk["w2"], pk["misc"])
    return loss2d[0, 0], preds


# ------------------------------------ main ------------------------------------

if __name__ == "__main__":
    key = jax.random.PRNGKey(0)
    k_img, k_lbl, k_par = jax.random.split(key, 3)

    image = jax.random.normal(k_img, (B, C, IMG, IMG), jnp.float32)   # NCHW
    labels = jax.random.randint(k_lbl, (B,), 0, NUM_CLASSES, jnp.int32)
    params = init_params(k_par)
    packed = pack_params(params)                                      # one-time repack

    loss, preds = crisis_vit_pretrain_binary(image, labels, packed)
    jax.block_until_ready((loss, preds))

    assert preds.shape == (B, NUM_CLASSES)
    assert loss.shape == ()
    assert bool(jnp.isfinite(loss))
    print("KERNEL_OK")
</pallas_src>

<mosaic_0001>
module attributes {stable_mosaic.version = 11 : i64} {
  func.func @_crisis_vit_kernel(%arg0: memref<2xi32, #tpu.memory_space<smem>>, %arg1: memref<10x192xbf16, #tpu.memory_space<vmem>>, %arg2: memref<192x32xbf16, #tpu.memory_space<vmem>>, %arg3: memref<2x32x192xbf16, #tpu.memory_space<vmem>>, %arg4: memref<2x64x32xbf16, #tpu.memory_space<vmem>>, %arg5: memref<41x96xf32, #tpu.memory_space<vmem>>, %arg6: memref<1x1xf32, #tpu.memory_space<vmem>>, %arg7: memref<2x2xf32, #tpu.memory_space<vmem>>) attributes {dimension_semantics = [], scalar_prefetch = 0 : i64, scratch_operands = 0 : i64, tpu.core_type = #tpu.core_type<tc>} {
    %c16 = arith.constant 16 : index
    %c0 = arith.constant 0 : index
    %0 = vector.load %arg5[%c16, %c0] : memref<41x96xf32, #tpu.memory_space<vmem>>, vector<10x32xf32>
    %c31 = arith.constant 31 : index
    %c0_0 = arith.constant 0 : index
    %1 = vector.load %arg5[%c31, %c0_0] : memref<41x96xf32, #tpu.memory_space<vmem>>, vector<10x10xf32>
    %c0_1 = arith.constant 0 : index
    %c0_2 = arith.constant 0 : index
    %2 = vector.load %arg1[%c0_1, %c0_2] : memref<10x192xbf16, #tpu.memory_space<vmem>>, vector<10x192xbf16>
    %c0_3 = arith.constant 0 : index
    %c0_4 = arith.constant 0 : index
    %3 = vector.load %arg2[%c0_3, %c0_4] : memref<192x32xbf16, #tpu.memory_space<vmem>>, vector<192x32xbf16>
    %cst = arith.constant dense<0.000000e+00> : vector<10x32xf32>
    %4 = tpu.matmul %2, %3, %cst {dimension_numbers = #tpu.dot_dimension_numbers<[1], [0], [0], [1], [0, 0, 1, 1], [], []>} : vector<10x192xbf16>, vector<192x32xbf16>, vector<10x32xf32> -> vector<10x32xf32>
    %5 = arith.addf %4, %0 : vector<10x32xf32>
    %c0_5 = arith.constant 0 : index
    %c0_6 = arith.constant 0 : index
    %6 = vector.load %arg5[%c0_5, %c0_6] : memref<41x96xf32, #tpu.memory_space<vmem>>, vector<1x32xf32>
    %c1 = arith.constant 1 : index
    %c0_7 = arith.constant 0 : index
    %7 = vector.load %arg5[%c1, %c0_7] : memref<41x96xf32, #tpu.memory_space<vmem>>, vector<1x32xf32>
    %c2 = arith.constant 2 : index
    %c0_8 = arith.constant 0 : index
    %8 = vector.load %arg5[%c2, %c0_8] : memref<41x96xf32, #tpu.memory_space<vmem>>, vector<1x96xf32>
    %c3 = arith.constant 3 : index
    %c0_9 = arith.constant 0 : index
    %9 = vector.load %arg5[%c3, %c0_9] : memref<41x96xf32, #tpu.memory_space<vmem>>, vector<1x32xf32>
    %c4 = arith.constant 4 : index
    %c0_10 = arith.constant 0 : index
    %10 = vector.load %arg5[%c4, %c0_10] : memref<41x96xf32, #tpu.memory_space<vmem>>, vector<1x32xf32>
    %c5 = arith.constant 5 : index
    %c0_11 = arith.constant 0 : index
    %11 = vector.load %arg5[%c5, %c0_11] : memref<41x96xf32, #tpu.memory_space<vmem>>, vector<1x32xf32>
    %c6 = arith.constant 6 : index
    %c0_12 = arith.constant 0 : index
    %12 = vector.load %arg5[%c6, %c0_12] : memref<41x96xf32, #tpu.memory_space<vmem>>, vector<1x64xf32>
    %c7 = arith.constant 7 : index
    %c0_13 = arith.constant 0 : index
    %13 = vector.load %arg5[%c7, %c0_13] : memref<41x96xf32, #tpu.memory_space<vmem>>, vector<1x32xf32>
    %c0_14 = arith.constant 0 : index
    %c0_15 = arith.constant 0 : index
    %c0_16 = arith.constant 0 : index
    %14 = vector.load %arg3[%c0_14, %c0_15, %c0_16] : memref<2x32x192xbf16, #tpu.memory_space<vmem>>, vector<1x32x192xbf16>
    %15 = vector.shape_cast %14 : vector<1x32x192xbf16> to vector<32x192xbf16>
    %16 = vector.extract_strided_slice %15 {offsets = [0, 0], sizes = [32, 96], strides = [1, 1]} : vector<32x192xbf16> to vector<32x96xbf16>
    %17 = vector.extract_strided_slice %15 {offsets = [0, 96], sizes = [32, 32], strides = [1, 1]} : vector<32x192xbf16> to vector<32x32xbf16>
    %18 = vector.extract_strided_slice %15 {offsets = [0, 128], sizes = [32, 64], strides = [1, 1]} : vector<32x192xbf16> to vector<32x64xbf16>
    %c0_17 = arith.constant 0 : index
    %c0_18 = arith.constant 0 : index
    %c0_19 = arith.constant 0 : index
    %19 = vector.load %arg4[%c0_17, %c0_18, %c0_19] : memref<2x64x32xbf16, #tpu.memory_space<vmem>>, vector<1x64x32xbf16>
    %20 = vector.shape_cast %19 : vector<1x64x32xbf16> to vector<64x32xbf16>
    %cst_20 = arith.constant dense<0.000000e+00> : vector<10xf32>
    %21 = vector.multi_reduction <add>, %5, %cst_20 [1] : vector<10x32xf32> to vector<10xf32>
    %22 = vector.shape_cast %21 : vector<10xf32> to vector<10x1xf32>
    %cst_21 = arith.constant 3.200000e+01 : f32
    %23 = vector.broadcast %cst_21 : f32 to vector<10x1xf32>
    %24 = arith.divf %22, %23 : vector<10x1xf32>
    %25 = vector.broadcast %24 : vector<10x1xf32> to vector<10x32xf32>
    %26 = arith.subf %5, %25 : vector<10x32xf32>
    %27 = arith.mulf %26, %26 : vector<10x32xf32>
    %cst_22 = arith.constant dense<0.000000e+00> : vector<10xf32>
    %28 = vector.multi_reduction <add>, %27, %cst_22 [1] : vector<10x32xf32> to vector<10xf32>
    %29 = vector.shape_cast %28 : vector<10xf32> to vector<10x1xf32>
    %cst_23 = arith.constant 3.200000e+01 : f32
    %30 = vector.broadcast %cst_23 : f32 to vector<10x1xf32>
    %31 = arith.divf %29, %30 : vector<10x1xf32>
    %cst_24 = arith.constant 9.99999997E-7 : f32
    %32 = vector.broadcast %cst_24 : f32 to vector<10x1xf32>
    %33 = arith.addf %31, %32 : vector<10x1xf32>
    %34 = math.rsqrt %33 : vector<10x1xf32>
    %35 = vector.broadcast %34 : vector<10x1xf32> to vector<10x32xf32>
    %36 = arith.mulf %26, %35 : vector<10x32xf32>
    %37 = vector.broadcast %6 : vector<1x32xf32> to vector<10x32xf32>
    %38 = arith.mulf %36, %37 : vector<10x32xf32>
    %39 = vector.broadcast %7 : vector<1x32xf32> to vector<10x32xf32>
    %40 = arith.addf %38, %39 : vector<10x32xf32>
    %41 = arith.truncf %40 : vector<10x32xf32> to vector<10x32xbf16>
    %cst_25 = arith.constant dense<0.000000e+00> : vector<10x96xf32>
    %42 = tpu.matmul %41, %16, %cst_25 {dimension_numbers = #tpu.dot_dimension_numbers<[1], [0], [0], [1], [0, 0, 1, 1], [], []>} : vector<10x32xbf16>, vector<32x96xbf16>, vector<10x96xf32> -> vector<10x96xf32>
    %43 = vector.broadcast %8 : vector<1x96xf32> to vector<10x96xf32>
    %44 = arith.addf %42, %43 : vector<10x96xf32>
    %45 = vector.extract_strided_slice %44 {offsets = [0, 0], sizes = [10, 8], strides = [1, 1]} : vector<10x96xf32> to vector<10x8xf32>
    %cst_26 = arith.constant 0.353553385 : f32
    %46 = vector.broadcast %cst_26 : f32 to vector<10x8xf32>
    %47 = arith.mulf %45, %46 : vector<10x8xf32>
    %48 = vector.extract_strided_slice %44 {offsets = [0, 32], sizes = [10, 8], strides = [1, 1]} : vector<10x96xf32> to vector<10x8xf32>
    %49 = vector.extract_strided_slice %44 {offsets = [0, 64], sizes = [10, 8], strides = [1, 1]} : vector<10x96xf32> to vector<10x8xf32>
    %cst_27 = arith.constant dense<0.000000e+00> : vector<10x10xf32>
    %50 = tpu.matmul %47, %48, %cst_27 {dimension_numbers = #tpu.dot_dimension_numbers<[1], [1], [0], [0], [0, 0, 1, 0], [], []>} : vector<10x8xf32>, vector<10x8xf32>, vector<10x10xf32> -> vector<10x10xf32>
    %51 = arith.addf %50, %1 : vector<10x10xf32>
    %cst_28 = arith.constant dense<0xFF800000> : vector<10xf32>
    %52 = vector.multi_reduction <maximumf>, %51, %cst_28 [1] : vector<10x10xf32> to vector<10xf32>
    %53 = vector.shape_cast %52 : vector<10xf32> to vector<10x1xf32>
    %54 = vector.broadcast %53 : vector<10x1xf32> to vector<10x10xf32>
    %55 = arith.subf %51, %54 : vector<10x10xf32>
    %56 = math.exp %55 : vector<10x10xf32>
    %cst_29 = arith.constant dense<0.000000e+00> : vector<10xf32>
    %57 = vector.multi_reduction <add>, %56, %cst_29 [1] : vector<10x10xf32> to vector<10xf32>
    %58 = vector.shape_cast %57 : vector<10xf32> to vector<10x1xf32>
    %59 = tpu.reciprocal %58 {approx = true} : vector<10x1xf32> -> vector<10x1xf32>
    %60 = vector.broadcast %59 : vector<10x1xf32> to vector<10x10xf32>
    %61 = arith.mulf %56, %60 : vector<10x10xf32>
    %cst_30 = arith.constant dense<0.000000e+00> : vector<10x8xf32>
    %62 = tpu.matmul %61, %49, %cst_30 {dimension_numbers = #tpu.dot_dimension_numbers<[1], [0], [0], [1], [0, 0, 1, 1], [], []>} : vector<10x10xf32>, vector<10x8xf32>, vector<10x8xf32> -> vector<10x8xf32>
    %63 = vector.extract_strided_slice %44 {offsets = [0, 8], sizes = [10, 8], strides = [1, 1]} : vector<10x96xf32> to vector<10x8xf32>
    %cst_31 = arith.constant 0.353553385 : f32
    %64 = vector.broadcast %cst_31 : f32 to vector<10x8xf32>
    %65 = arith.mulf %63, %64 : vector<10x8xf32>
    %66 = vector.extract_strided_slice %44 {offsets = [0, 40], sizes = [10, 8], strides = [1, 1]} : vector<10x96xf32> to vector<10x8xf32>
    %67 = vector.extract_strided_slice %44 {offsets = [0, 72], sizes = [10, 8], strides = [1, 1]} : vector<10x96xf32> to vector<10x8xf32>
    %cst_32 = arith.constant dense<0.000000e+00> : vector<10x10xf32>
    %68 = tpu.matmul %65, %66, %cst_32 {dimension_numbers = #tpu.dot_dimension_numbers<[1], [1], [0], [0], [0, 0, 1, 0], [], []>} : vector<10x8xf32>, vector<10x8xf32>, vector<10x10xf32> -> vector<10x10xf32>
    %69 = arith.addf %68, %1 : vector<10x10xf32>
    %cst_33 = arith.constant dense<0xFF800000> : vector<10xf32>
    %70 = vector.multi_reduction <maximumf>, %69, %cst_33 [1] : vector<10x10xf32> to vector<10xf32>
    %71 = vector.shape_cast %70 : vector<10xf32> to vector<10x1xf32>
    %72 = vector.broadcast %71 : vector<10x1xf32> to vector<10x10xf32>
    %73 = arith.subf %69, %72 : vector<10x10xf32>
    %74 = math.exp %73 : vector<10x10xf32>
    %cst_34 = arith.constant dense<0.000000e+00> : vector<10xf32>
    %75 = vector.multi_reduction <add>, %74, %cst_34 [1] : vector<10x10xf32> to vector<10xf32>
    %76 = vector.shape_cast %75 : vector<10xf32> to vector<10x1xf32>
    %77 = tpu.reciprocal %76 {approx = true} : vector<10x1xf32> -> vector<10x1xf32>
    %78 = vector.broadcast %77 : vector<10x1xf32> to vector<10x10xf32>
    %79 = arith.mulf %74, %78 : vector<10x10xf32>
    %cst_35 = arith.constant dense<0.000000e+00> : vector<10x8xf32>
    %80 = tpu.matmul %79, %67, %cst_35 {dimension_numbers = #tpu.dot_dimension_numbers<[1], [0], [0], [1], [0, 0, 1, 1], [], []>} : vector<10x10xf32>, vector<10x8xf32>, vector<10x8xf32> -> vector<10x8xf32>
    %81 = vector.extract_strided_slice %44 {offsets = [0, 16], sizes = [10, 8], strides = [1, 1]} : vector<10x96xf32> to vector<10x8xf32>
    %cst_36 = arith.constant 0.353553385 : f32
    %82 = vector.broadcast %cst_36 : f32 to vector<10x8xf32>
    %83 = arith.mulf %81, %82 : vector<10x8xf32>
    %84 = vector.extract_strided_slice %44 {offsets = [0, 48], sizes = [10, 8], strides = [1, 1]} : vector<10x96xf32> to vector<10x8xf32>
    %85 = vector.extract_strided_slice %44 {offsets = [0, 80], sizes = [10, 8], strides = [1, 1]} : vector<10x96xf32> to vector<10x8xf32>
    %cst_37 = arith.constant dense<0.000000e+00> : vector<10x10xf32>
    %86 = tpu.matmul %83, %84, %cst_37 {dimension_numbers = #tpu.dot_dimension_numbers<[1], [1], [0], [0], [0, 0, 1, 0], [], []>} : vector<10x8xf32>, vector<10x8xf32>, vector<10x10xf32> -> vector<10x10xf32>
    %87 = arith.addf %86, %1 : vector<10x10xf32>
    %cst_38 = arith.constant dense<0xFF800000> : vector<10xf32>
    %88 = vector.multi_reduction <maximumf>, %87, %cst_38 [1] : vector<10x10xf32> to vector<10xf32>
    %89 = vector.shape_cast %88 : vector<10xf32> to vector<10x1xf32>
    %90 = vector.broadcast %89 : vector<10x1xf32> to vector<10x10xf32>
    %91 = arith.subf %87, %90 : vector<10x10xf32>
    %92 = math.exp %91 : vector<10x10xf32>
    %cst_39 = arith.constant dense<0.000000e+00> : vector<10xf32>
    %93 = vector.multi_reduction <add>, %92, %cst_39 [1] : vector<10x10xf32> to vector<10xf32>
    %94 = vector.shape_cast %93 : vector<10xf32> to vector<10x1xf32>
    %95 = tpu.reciprocal %94 {approx = true} : vector<10x1xf32> -> vector<10x1xf32>
    %96 = vector.broadcast %95 : vector<10x1xf32> to vector<10x10xf32>
    %97 = arith.mulf %92, %96 : vector<10x10xf32>
    %cst_40 = arith.constant dense<0.000000e+00> : vector<10x8xf32>
    %98 = tpu.matmul %97, %85, %cst_40 {dimension_numbers = #tpu.dot_dimension_numbers<[1], [0], [0], [1], [0, 0, 1, 1], [], []>} : vector<10x10xf32>, vector<10x8xf32>, vector<10x8xf32> -> vector<10x8xf32>
    %99 = vector.extract_strided_slice %44 {offsets = [0, 24], sizes = [10, 8], strides = [1, 1]} : vector<10x96xf32> to vector<10x8xf32>
    %cst_41 = arith.constant 0.353553385 : f32
    %100 = vector.broadcast %cst_41 : f32 to vector<10x8xf32>
    %101 = arith.mulf %99, %100 : vector<10x8xf32>
    %102 = vector.extract_strided_slice %44 {offsets = [0, 56], sizes = [10, 8], strides = [1, 1]} : vector<10x96xf32> to vector<10x8xf32>
    %103 = vector.extract_strided_slice %44 {offsets = [0, 88], sizes = [10, 8], strides = [1, 1]} : vector<10x96xf32> to vector<10x8xf32>
    %cst_42 = arith.constant dense<0.000000e+00> : vector<10x10xf32>
    %104 = tpu.matmul %101, %102, %cst_42 {dimension_numbers = #tpu.dot_dimension_numbers<[1], [1], [0], [0], [0, 0, 1, 0], [], []>} : vector<10x8xf32>, vector<10x8xf32>, vector<10x10xf32> -> vector<10x10xf32>
    %105 = arith.addf %104, %1 : vector<10x10xf32>
    %cst_43 = arith.constant dense<0xFF800000> : vector<10xf32>
    %106 = vector.multi_reduction <maximumf>, %105, %cst_43 [1] : vector<10x10xf32> to vector<10xf32>
    %107 = vector.shape_cast %106 : vector<10xf32> to vector<10x1xf32>
    %108 = vector.broadcast %107 : vector<10x1xf32> to vector<10x10xf32>
    %109 = arith.subf %105, %108 : vector<10x10xf32>
    %110 = math.exp %109 : vector<10x10xf32>
    %cst_44 = arith.constant dense<0.000000e+00> : vector<10xf32>
    %111 = vector.multi_reduction <add>, %110, %cst_44 [1] : vector<10x10xf32> to vector<10xf32>
    %112 = vector.shape_cast %111 : vector<10xf32> to vector<10x1xf32>
    %113 = tpu.reciprocal %112 {approx = true} : vector<10x1xf32> -> vector<10x1xf32>
    %114 = vector.broadcast %113 : vector<10x1xf32> to vector<10x10xf32>
    %115 = arith.mulf %110, %114 : vector<10x10xf32>
    %cst_45 = arith.constant dense<0.000000e+00> : vector<10x8xf32>
    %116 = tpu.matmul %115, %103, %cst_45 {dimension_numbers = #tpu.dot_dimension_numbers<[1], [0], [0], [1], [0, 0, 1, 1], [], []>} : vector<10x10xf32>, vector<10x8xf32>, vector<10x8xf32> -> vector<10x8xf32>
    %117 = tpu.concatenate %62, %80, %98, %116 in 1 : vector<10x8xf32>, vector<10x8xf32>, vector<10x8xf32>, vector<10x8xf32> -> vector<10x32xf32>
    %118 = arith.truncf %117 : vector<10x32xf32> to vector<10x32xbf16>
    %cst_46 = arith.constant dense<0.000000e+00> : vector<10x32xf32>
    %119 = tpu.matmul %118, %17, %cst_46 {dimension_numbers = #tpu.dot_dimension_numbers<[1], [0], [0], [1], [0, 0, 1, 1], [], []>} : vector<10x32xbf16>, vector<32x32xbf16>, vector<10x32xf32> -> vector<10x32xf32>
    %120 = arith.addf %5, %119 : vector<10x32xf32>
    %121 = vector.broadcast %9 : vector<1x32xf32> to vector<10x32xf32>
    %122 = arith.addf %120, %121 : vector<10x32xf32>
    %cst_47 = arith.constant dense<0.000000e+00> : vector<10xf32>
    %123 = vector.multi_reduction <add>, %122, %cst_47 [1] : vector<10x32xf32> to vector<10xf32>
    %124 = vector.shape_cast %123 : vector<10xf32> to vector<10x1xf32>
    %cst_48 = arith.constant 3.200000e+01 : f32
    %125 = vector.broadcast %cst_48 : f32 to vector<10x1xf32>
    %126 = arith.divf %124, %125 : vector<10x1xf32>
    %127 = vector.broadcast %126 : vector<10x1xf32> to vector<10x32xf32>
    %128 = arith.subf %122, %127 : vector<10x32xf32>
    %129 = arith.mulf %128, %128 : vector<10x32xf32>
    %cst_49 = arith.constant dense<0.000000e+00> : vector<10xf32>
    %130 = vector.multi_reduction <add>, %129, %cst_49 [1] : vector<10x32xf32> to vector<10xf32>
    %131 = vector.shape_cast %130 : vector<10xf32> to vector<10x1xf32>
    %cst_50 = arith.constant 3.200000e+01 : f32
    %132 = vector.broadcast %cst_50 : f32 to vector<10x1xf32>
    %133 = arith.divf %131, %132 : vector<10x1xf32>
    %cst_51 = arith.constant 9.99999997E-7 : f32
    %134 = vector.broadcast %cst_51 : f32 to vector<10x1xf32>
    %135 = arith.addf %133, %134 : vector<10x1xf32>
    %136 = math.rsqrt %135 : vector<10x1xf32>
    %137 = vector.broadcast %136 : vector<10x1xf32> to vector<10x32xf32>
    %138 = arith.mulf %128, %137 : vector<10x32xf32>
    %139 = vector.broadcast %10 : vector<1x32xf32> to vector<10x32xf32>
    %140 = arith.mulf %138, %139 : vector<10x32xf32>
    %141 = vector.broadcast %11 : vector<1x32xf32> to vector<10x32xf32>
    %142 = arith.addf %140, %141 : vector<10x32xf32>
    %143 = arith.truncf %142 : vector<10x32xf32> to vector<10x32xbf16>
    %cst_52 = arith.constant dense<0.000000e+00> : vector<10x64xf32>
    %144 = tpu.matmul %143, %18, %cst_52 {dimension_numbers = #tpu.dot_dimension_numbers<[1], [0], [0], [1], [0, 0, 1, 1], [], []>} : vector<10x32xbf16>, vector<32x64xbf16>, vector<10x64xf32> -> vector<10x64xf32>
    %145 = vector.broadcast %12 : vector<1x64xf32> to vector<10x64xf32>
    %146 = arith.addf %144, %145 : vector<10x64xf32>
    %cst_53 = arith.constant 5.000000e-01 : f32
    %147 = vector.broadcast %cst_53 : f32 to vector<10x64xf32>
    %148 = arith.mulf %147, %146 : vector<10x64xf32>
    %cst_54 = arith.constant 0.707106769 : f32
    %149 = vector.broadcast %cst_54 : f32 to vector<10x64xf32>
    %150 = arith.mulf %146, %149 : vector<10x64xf32>
    %151 = math.absf %150 : vector<10x64xf32>
    %cst_55 = arith.constant 0.327591091 : f32
    %152 = vector.broadcast %cst_55 : f32 to vector<10x64xf32>
    %153 = arith.mulf %152, %151 : vector<10x64xf32>
    %cst_56 = arith.constant 1.000000e+00 : f32
    %154 = vector.broadcast %cst_56 : f32 to vector<10x64xf32>
    %155 = arith.addf %154, %153 : vector<10x64xf32>
    %cst_57 = arith.constant 1.000000e+00 : f32
    %156 = vector.broadcast %cst_57 : f32 to vector<10x64xf32>
    %157 = arith.divf %156, %155 : vector<10x64xf32>
    %cst_58 = arith.constant 1.06140542 : f32
    %158 = vector.broadcast %cst_58 : f32 to vector<10x64xf32>
    %159 = arith.mulf %158, %157 : vector<10x64xf32>
    %cst_59 = arith.constant 1.45315206 : f32
    %160 = vector.broadcast %cst_59 : f32 to vector<10x64xf32>
    %161 = arith.subf %159, %160 : vector<10x64xf32>
    %162 = arith.mulf %161, %157 : vector<10x64xf32>
    %cst_60 = arith.constant 1.42141378 : f32
    %163 = vector.broadcast %cst_60 : f32 to vector<10x64xf32>
    %164 = arith.addf %162, %163 : vector<10x64xf32>
    %165 = arith.mulf %164, %157 : vector<10x64xf32>
    %cst_61 = arith.constant 0.284496725 : f32
    %166 = vector.broadcast %cst_61 : f32 to vector<10x64xf32>
    %167 = arith.subf %165, %166 : vector<10x64xf32>
    %168 = arith.mulf %167, %157 : vector<10x64xf32>
    %cst_62 = arith.constant 0.254829586 : f32
    %169 = vector.broadcast %cst_62 : f32 to vector<10x64xf32>
    %170 = arith.addf %168, %169 : vector<10x64xf32>
    %171 = arith.mulf %170, %157 : vector<10x64xf32>
    %172 = arith.mulf %150, %150 : vector<10x64xf32>
    %cst_63 = arith.constant 0.000000e+00 : f32
    %173 = vector.broadcast %cst_63 : f32 to vector<10x64xf32>
    %174 = arith.subf %173, %172 : vector<10x64xf32>
    %175 = math.exp %174 : vector<10x64xf32>
    %176 = arith.mulf %171, %175 : vector<10x64xf32>
    %cst_64 = arith.constant 1.000000e+00 : f32
    %177 = vector.broadcast %cst_64 : f32 to vector<10x64xf32>
    %178 = arith.subf %177, %176 : vector<10x64xf32>
    %cst_65 = arith.constant 0.000000e+00 : f32
    %179 = vector.broadcast %cst_65 : f32 to vector<10x64xf32>
    %180 = arith.cmpf oge, %150, %179 : vector<10x64xf32>
    %cst_66 = arith.constant 0.000000e+00 : f32
    %181 = vector.broadcast %cst_66 : f32 to vector<10x64xf32>
    %182 = arith.subf %181, %178 : vector<10x64xf32>
    %183 = arith.select %180, %178, %182 : vector<10x64xi1>, vector<10x64xf32>
    %cst_67 = arith.constant 1.000000e+00 : f32
    %184 = vector.broadcast %cst_67 : f32 to vector<10x64xf32>
    %185 = arith.addf %184, %183 : vector<10x64xf32>
    %186 = arith.mulf %148, %185 : vector<10x64xf32>
    %187 = arith.truncf %186 : vector<10x64xf32> to vector<10x64xbf16>
    %cst_68 = arith.constant dense<0.000000e+00> : vector<10x32xf32>
    %188 = tpu.matmul %187, %20, %cst_68 {dimension_numbers = #tpu.dot_dimension_numbers<[1], [0], [0], [1], [0, 0, 1, 1], [], []>} : vector<10x64xbf16>, vector<64x32xbf16>, vector<10x32xf32> -> vector<10x32xf32>
    %189 = arith.addf %122, %188 : vector<10x32xf32>
    %190 = vector.broadcast %13 : vector<1x32xf32> to vector<10x32xf32>
    %191 = arith.addf %189, %190 : vector<10x32xf32>
    %c8 = arith.constant 8 : index
    %c0_69 = arith.constant 0 : index
    %192 = vector.load %arg5[%c8, %c0_69] : memref<41x96xf32, #tpu.memory_space<vmem>>, vector<1x32xf32>
    %c9 = arith.constant 9 : index
    %c0_70 = arith.constant 0 : index
    %193 = vector.load %arg5[%c9, %c0_70] : memref<41x96xf32, #tpu.memory_space<vmem>>, vector<1x32xf32>
    %c10 = arith.constant 10 : index
    %c0_71 = arith.constant 0 : index
    %194 = vector.load %arg5[%c10, %c0_71] : memref<41x96xf32, #tpu.memory_space<vmem>>, vector<1x96xf32>
    %c11 = arith.constant 11 : index
    %c0_72 = arith.constant 0 : index
    %195 = vector.load %arg5[%c11, %c0_72] : memref<41x96xf32, #tpu.memory_space<vmem>>, vector<1x32xf32>
    %c12 = arith.constant 12 : index
    %c0_73 = arith.constant 0 : index
    %196 = vector.load %arg5[%c12, %c0_73] : memref<41x96xf32, #tpu.memory_space<vmem>>, vector<1x32xf32>
    %c13 = arith.constant 13 : index
    %c0_74 = arith.constant 0 : index
    %197 = vector.load %arg5[%c13, %c0_74] : memref<41x96xf32, #tpu.memory_space<vmem>>, vector<1x32xf32>
    %c14 = arith.constant 14 : index
    %c0_75 = arith.constant 0 : index
    %198 = vector.load %arg5[%c14, %c0_75] : memref<41x96xf32, #tpu.memory_space<vmem>>, vector<1x64xf32>
    %c15 = arith.constant 15 : index
    %c0_76 = arith.constant 0 : index
    %199 = vector.load %arg5[%c15, %c0_76] : memref<41x96xf32, #tpu.memory_space<vmem>>, vector<1x32xf32>
    %c1_77 = arith.constant 1 : index
    %c0_78 = arith.constant 0 : index
    %c0_79 = arith.constant 0 : index
    %200 = vector.load %arg3[%c1_77, %c0_78, %c0_79] : memref<2x32x192xbf16, #tpu.memory_space<vmem>>, vector<1x32x192xbf16>
    %201 = vector.shape_cast %200 : vector<1x32x192xbf16> to vector<32x192xbf16>
    %202 = vector.extract_strided_slice %201 {offsets = [0, 0], sizes = [32, 96], strides = [1, 1]} : vector<32x192xbf16> to vector<32x96xbf16>
    %203 = vector.extract_strided_slice %201 {offsets = [0, 96], sizes = [32, 32], strides = [1, 1]} : vector<32x192xbf16> to vector<32x32xbf16>
    %204 = vector.extract_strided_slice %201 {offsets = [0, 128], sizes = [32, 64], strides = [1, 1]} : vector<32x192xbf16> to vector<32x64xbf16>
    %c1_80 = arith.constant 1 : index
    %c0_81 = arith.constant 0 : index
    %c0_82 = arith.constant 0 : index
    %205 = vector.load %arg4[%c1_80, %c0_81, %c0_82] : memref<2x64x32xbf16, #tpu.memory_space<vmem>>, vector<1x64x32xbf16>
    %206 = vector.shape_cast %205 : vector<1x64x32xbf16> to vector<64x32xbf16>
    %cst_83 = arith.constant dense<0.000000e+00> : vector<10xf32>
    %207 = vector.multi_reduction <add>, %191, %cst_83 [1] : vector<10x32xf32> to vector<10xf32>
    %208 = vector.shape_cast %207 : vector<10xf32> to vector<10x1xf32>
    %cst_84 = arith.constant 3.200000e+01 : f32
    %209 = vector.broadcast %cst_84 : f32 to vector<10x1xf32>
    %210 = arith.divf %208, %209 : vector<10x1xf32>
    %211 = vector.broadcast %210 : vector<10x1xf32> to vector<10x32xf32>
    %212 = arith.subf %191, %211 : vector<10x32xf32>
    %213 = arith.mulf %212, %212 : vector<10x32xf32>
    %cst_85 = arith.constant dense<0.000000e+00> : vector<10xf32>
    %214 = vector.multi_reduction <add>, %213, %cst_85 [1] : vector<10x32xf32> to vector<10xf32>
    %215 = vector.shape_cast %214 : vector<10xf32> to vector<10x1xf32>
    %cst_86 = arith.constant 3.200000e+01 : f32
    %216 = vector.broadcast %cst_86 : f32 to vector<10x1xf32>
    %217 = arith.divf %215, %216 : vector<10x1xf32>
    %cst_87 = arith.constant 9.99999997E-7 : f32
    %218 = vector.broadcast %cst_87 : f32 to vector<10x1xf32>
    %219 = arith.addf %217, %218 : vector<10x1xf32>
    %220 = math.rsqrt %219 : vector<10x1xf32>
    %221 = vector.broadcast %220 : vector<10x1xf32> to vector<10x32xf32>
    %222 = arith.mulf %212, %221 : vector<10x32xf32>
    %223 = vector.broadcast %192 : vector<1x32xf32> to vector<10x32xf32>
    %224 = arith.mulf %222, %223 : vector<10x32xf32>
    %225 = vector.broadcast %193 : vector<1x32xf32> to vector<10x32xf32>
    %226 = arith.addf %224, %225 : vector<10x32xf32>
    %227 = arith.truncf %226 : vector<10x32xf32> to vector<10x32xbf16>
    %cst_88 = arith.constant dense<0.000000e+00> : vector<10x96xf32>
    %228 = tpu.matmul %227, %202, %cst_88 {dimension_numbers = #tpu.dot_dimension_numbers<[1], [0], [0], [1], [0, 0, 1, 1], [], []>} : vector<10x32xbf16>, vector<32x96xbf16>, vector<10x96xf32> -> vector<10x96xf32>
    %229 = vector.broadcast %194 : vector<1x96xf32> to vector<10x96xf32>
    %230 = arith.addf %228, %229 : vector<10x96xf32>
    %231 = vector.extract_strided_slice %230 {offsets = [0, 0], sizes = [10, 8], strides = [1, 1]} : vector<10x96xf32> to vector<10x8xf32>
    %cst_89 = arith.constant 0.353553385 : f32
    %232 = vector.broadcast %cst_89 : f32 to vector<10x8xf32>
    %233 = arith.mulf %231, %232 : vector<10x8xf32>
    %234 = vector.extract_strided_slice %230 {offsets = [0, 32], sizes = [10, 8], strides = [1, 1]} : vector<10x96xf32> to vector<10x8xf32>
    %235 = vector.extract_strided_slice %230 {offsets = [0, 64], sizes = [10, 8], strides = [1, 1]} : vector<10x96xf32> to vector<10x8xf32>
    %cst_90 = arith.constant dense<0.000000e+00> : vector<10x10xf32>
    %236 = tpu.matmul %233, %234, %cst_90 {dimension_numbers = #tpu.dot_dimension_numbers<[1], [1], [0], [0], [0, 0, 1, 0], [], []>} : vector<10x8xf32>, vector<10x8xf32>, vector<10x10xf32> -> vector<10x10xf32>
    %237 = arith.addf %236, %1 : vector<10x10xf32>
    %cst_91 = arith.constant dense<0xFF800000> : vector<10xf32>
    %238 = vector.multi_reduction <maximumf>, %237, %cst_91 [1] : vector<10x10xf32> to vector<10xf32>
    %239 = vector.shape_cast %238 : vector<10xf32> to vector<10x1xf32>
    %240 = vector.broadcast %239 : vector<10x1xf32> to vector<10x10xf32>
    %241 = arith.subf %237, %240 : vector<10x10xf32>
    %242 = math.exp %241 : vector<10x10xf32>
    %cst_92 = arith.constant dense<0.000000e+00> : vector<10xf32>
    %243 = vector.multi_reduction <add>, %242, %cst_92 [1] : vector<10x10xf32> to vector<10xf32>
    %244 = vector.shape_cast %243 : vector<10xf32> to vector<10x1xf32>
    %245 = tpu.reciprocal %244 {approx = true} : vector<10x1xf32> -> vector<10x1xf32>
    %246 = vector.broadcast %245 : vector<10x1xf32> to vector<10x10xf32>
    %247 = arith.mulf %242, %246 : vector<10x10xf32>
    %cst_93 = arith.constant dense<0.000000e+00> : vector<10x8xf32>
    %248 = tpu.matmul %247, %235, %cst_93 {dimension_numbers = #tpu.dot_dimension_numbers<[1], [0], [0], [1], [0, 0, 1, 1], [], []>} : vector<10x10xf32>, vector<10x8xf32>, vector<10x8xf32> -> vector<10x8xf32>
    %249 = vector.extract_strided_slice %230 {offsets = [0, 8], sizes = [10, 8], strides = [1, 1]} : vector<10x96xf32> to vector<10x8xf32>
    %cst_94 = arith.constant 0.353553385 : f32
    %250 = vector.broadcast %cst_94 : f32 to vector<10x8xf32>
    %251 = arith.mulf %249, %250 : vector<10x8xf32>
    %252 = vector.extract_strided_slice %230 {offsets = [0, 40], sizes = [10, 8], strides = [1, 1]} : vector<10x96xf32> to vector<10x8xf32>
    %253 = vector.extract_strided_slice %230 {offsets = [0, 72], sizes = [10, 8], strides = [1, 1]} : vector<10x96xf32> to vector<10x8xf32>
    %cst_95 = arith.constant dense<0.000000e+00> : vector<10x10xf32>
    %254 = tpu.matmul %251, %252, %cst_95 {dimension_numbers = #tpu.dot_dimension_numbers<[1], [1], [0], [0], [0, 0, 1, 0], [], []>} : vector<10x8xf32>, vector<10x8xf32>, vector<10x10xf32> -> vector<10x10xf32>
    %255 = arith.addf %254, %1 : vector<10x10xf32>
    %cst_96 = arith.constant dense<0xFF800000> : vector<10xf32>
    %256 = vector.multi_reduction <maximumf>, %255, %cst_96 [1] : vector<10x10xf32> to vector<10xf32>
    %257 = vector.shape_cast %256 : vector<10xf32> to vector<10x1xf32>
    %258 = vector.broadcast %257 : vector<10x1xf32> to vector<10x10xf32>
    %259 = arith.subf %255, %258 : vector<10x10xf32>
    %260 = math.exp %259 : vector<10x10xf32>
    %cst_97 = arith.constant dense<0.000000e+00> : vector<10xf32>
    %261 = vector.multi_reduction <add>, %260, %cst_97 [1] : vector<10x10xf32> to vector<10xf32>
    %262 = vector.shape_cast %261 : vector<10xf32> to vector<10x1xf32>
    %263 = tpu.reciprocal %262 {approx = true} : vector<10x1xf32> -> vector<10x1xf32>
    %264 = vector.broadcast %263 : vector<10x1xf32> to vector<10x10xf32>
    %265 = arith.mulf %260, %264 : vector<10x10xf32>
    %cst_98 = arith.constant dense<0.000000e+00> : vector<10x8xf32>
    %266 = tpu.matmul %265, %253, %cst_98 {dimension_numbers = #tpu.dot_dimension_numbers<[1], [0], [0], [1], [0, 0, 1, 1], [], []>} : vector<10x10xf32>, vector<10x8xf32>, vector<10x8xf32> -> vector<10x8xf32>
    %267 = vector.extract_strided_slice %230 {offsets = [0, 16], sizes = [10, 8], strides = [1, 1]} : vector<10x96xf32> to vector<10x8xf32>
    %cst_99 = arith.constant 0.353553385 : f32
    %268 = vector.broadcast %cst_99 : f32 to vector<10x8xf32>
    %269 = arith.mulf %267, %268 : vector<10x8xf32>
    %270 = vector.extract_strided_slice %230 {offsets = [0, 48], sizes = [10, 8], strides = [1, 1]} : vector<10x96xf32> to vector<10x8xf32>
    %271 = vector.extract_strided_slice %230 {offsets = [0, 80], sizes = [10, 8], strides = [1, 1]} : vector<10x96xf32> to vector<10x8xf32>
    %cst_100 = arith.constant dense<0.000000e+00> : vector<10x10xf32>
    %272 = tpu.matmul %269, %270, %cst_100 {dimension_numbers = #tpu.dot_dimension_numbers<[1], [1], [0], [0], [0, 0, 1, 0], [], []>} : vector<10x8xf32>, vector<10x8xf32>, vector<10x10xf32> -> vector<10x10xf32>
    %273 = arith.addf %272, %1 : vector<10x10xf32>
    %cst_101 = arith.constant dense<0xFF800000> : vector<10xf32>
    %274 = vector.multi_reduction <maximumf>, %273, %cst_101 [1] : vector<10x10xf32> to vector<10xf32>
    %275 = vector.shape_cast %274 : vector<10xf32> to vector<10x1xf32>
    %276 = vector.broadcast %275 : vector<10x1xf32> to vector<10x10xf32>
    %277 = arith.subf %273, %276 : vector<10x10xf32>
    %278 = math.exp %277 : vector<10x10xf32>
    %cst_102 = arith.constant dense<0.000000e+00> : vector<10xf32>
    %279 = vector.multi_reduction <add>, %278, %cst_102 [1] : vector<10x10xf32> to vector<10xf32>
    %280 = vector.shape_cast %279 : vector<10xf32> to vector<10x1xf32>
    %281 = tpu.reciprocal %280 {approx = true} : vector<10x1xf32> -> vector<10x1xf32>
    %282 = vector.broadcast %281 : vector<10x1xf32> to vector<10x10xf32>
    %283 = arith.mulf %278, %282 : vector<10x10xf32>
    %cst_103 = arith.constant dense<0.000000e+00> : vector<10x8xf32>
    %284 = tpu.matmul %283, %271, %cst_103 {dimension_numbers = #tpu.dot_dimension_numbers<[1], [0], [0], [1], [0, 0, 1, 1], [], []>} : vector<10x10xf32>, vector<10x8xf32>, vector<10x8xf32> -> vector<10x8xf32>
    %285 = vector.extract_strided_slice %230 {offsets = [0, 24], sizes = [10, 8], strides = [1, 1]} : vector<10x96xf32> to vector<10x8xf32>
    %cst_104 = arith.constant 0.353553385 : f32
    %286 = vector.broadcast %cst_104 : f32 to vector<10x8xf32>
    %287 = arith.mulf %285, %286 : vector<10x8xf32>
    %288 = vector.extract_strided_slice %230 {offsets = [0, 56], sizes = [10, 8], strides = [1, 1]} : vector<10x96xf32> to vector<10x8xf32>
    %289 = vector.extract_strided_slice %230 {offsets = [0, 88], sizes = [10, 8], strides = [1, 1]} : vector<10x96xf32> to vector<10x8xf32>
    %cst_105 = arith.constant dense<0.000000e+00> : vector<10x10xf32>
    %290 = tpu.matmul %287, %288, %cst_105 {dimension_numbers = #tpu.dot_dimension_numbers<[1], [1], [0], [0], [0, 0, 1, 0], [], []>} : vector<10x8xf32>, vector<10x8xf32>, vector<10x10xf32> -> vector<10x10xf32>
    %291 = arith.addf %290, %1 : vector<10x10xf32>
    %cst_106 = arith.constant dense<0xFF800000> : vector<10xf32>
    %292 = vector.multi_reduction <maximumf>, %291, %cst_106 [1] : vector<10x10xf32> to vector<10xf32>
    %293 = vector.shape_cast %292 : vector<10xf32> to vector<10x1xf32>
    %294 = vector.broadcast %293 : vector<10x1xf32> to vector<10x10xf32>
    %295 = arith.subf %291, %294 : vector<10x10xf32>
    %296 = math.exp %295 : vector<10x10xf32>
    %cst_107 = arith.constant dense<0.000000e+00> : vector<10xf32>
    %297 = vector.multi_reduction <add>, %296, %cst_107 [1] : vector<10x10xf32> to vector<10xf32>
    %298 = vector.shape_cast %297 : vector<10xf32> to vector<10x1xf32>
    %299 = tpu.reciprocal %298 {approx = true} : vector<10x1xf32> -> vector<10x1xf32>
    %300 = vector.broadcast %299 : vector<10x1xf32> to vector<10x10xf32>
    %301 = arith.mulf %296, %300 : vector<10x10xf32>
    %cst_108 = arith.constant dense<0.000000e+00> : vector<10x8xf32>
    %302 = tpu.matmul %301, %289, %cst_108 {dimension_numbers = #tpu.dot_dimension_numbers<[1], [0], [0], [1], [0, 0, 1, 1], [], []>} : vector<10x10xf32>, vector<10x8xf32>, vector<10x8xf32> -> vector<10x8xf32>
    %303 = tpu.concatenate %248, %266, %284, %302 in 1 : vector<10x8xf32>, vector<10x8xf32>, vector<10x8xf32>, vector<10x8xf32> -> vector<10x32xf32>
    %304 = arith.truncf %303 : vector<10x32xf32> to vector<10x32xbf16>
    %cst_109 = arith.constant dense<0.000000e+00> : vector<10x32xf32>
    %305 = tpu.matmul %304, %203, %cst_109 {dimension_numbers = #tpu.dot_dimension_numbers<[1], [0], [0], [1], [0, 0, 1, 1], [], []>} : vector<10x32xbf16>, vector<32x32xbf16>, vector<10x32xf32> -> vector<10x32xf32>
    %306 = arith.addf %191, %305 : vector<10x32xf32>
    %307 = vector.broadcast %195 : vector<1x32xf32> to vector<10x32xf32>
    %308 = arith.addf %306, %307 : vector<10x32xf32>
    %cst_110 = arith.constant dense<0.000000e+00> : vector<10xf32>
    %309 = vector.multi_reduction <add>, %308, %cst_110 [1] : vector<10x32xf32> to vector<10xf32>
    %310 = vector.shape_cast %309 : vector<10xf32> to vector<10x1xf32>
    %cst_111 = arith.constant 3.200000e+01 : f32
    %311 = vector.broadcast %cst_111 : f32 to vector<10x1xf32>
    %312 = arith.divf %310, %311 : vector<10x1xf32>
    %313 = vector.broadcast %312 : vector<10x1xf32> to vector<10x32xf32>
    %314 = arith.subf %308, %313 : vector<10x32xf32>
    %315 = arith.mulf %314, %314 : vector<10x32xf32>
    %cst_112 = arith.constant dense<0.000000e+00> : vector<10xf32>
    %316 = vector.multi_reduction <add>, %315, %cst_112 [1] : vector<10x32xf32> to vector<10xf32>
    %317 = vector.shape_cast %316 : vector<10xf32> to vector<10x1xf32>
    %cst_113 = arith.constant 3.200000e+01 : f32
    %318 = vector.broadcast %cst_113 : f32 to vector<10x1xf32>
    %319 = arith.divf %317, %318 : vector<10x1xf32>
    %cst_114 = arith.constant 9.99999997E-7 : f32
    %320 = vector.broadcast %cst_114 : f32 to vector<10x1xf32>
    %321 = arith.addf %319, %320 : vector<10x1xf32>
    %322 = math.rsqrt %321 : vector<10x1xf32>
    %323 = vector.broadcast %322 : vector<10x1xf32> to vector<10x32xf32>
    %324 = arith.mulf %314, %323 : vector<10x32xf32>
    %325 = vector.broadcast %196 : vector<1x32xf32> to vector<10x32xf32>
    %326 = arith.mulf %324, %325 : vector<10x32xf32>
    %327 = vector.broadcast %197 : vector<1x32xf32> to vector<10x32xf32>
    %328 = arith.addf %326, %327 : vector<10x32xf32>
    %329 = arith.truncf %328 : vector<10x32xf32> to vector<10x32xbf16>
    %cst_115 = arith.constant dense<0.000000e+00> : vector<10x64xf32>
    %330 = tpu.matmul %329, %204, %cst_115 {dimension_numbers = #tpu.dot_dimension_numbers<[1], [0], [0], [1], [0, 0, 1, 1], [], []>} : vector<10x32xbf16>, vector<32x64xbf16>, vector<10x64xf32> -> vector<10x64xf32>
    %331 = vector.broadcast %198 : vector<1x64xf32> to vector<10x64xf32>
    %332 = arith.addf %330, %331 : vector<10x64xf32>
    %cst_116 = arith.constant 5.000000e-01 : f32
    %333 = vector.broadcast %cst_116 : f32 to vector<10x64xf32>
    %334 = arith.mulf %333, %332 : vector<10x64xf32>
    %cst_117 = arith.constant 0.707106769 : f32
    %335 = vector.broadcast %cst_117 : f32 to vector<10x64xf32>
    %336 = arith.mulf %332, %335 : vector<10x64xf32>
    %337 = math.absf %336 : vector<10x64xf32>
    %cst_118 = arith.constant 0.327591091 : f32
    %338 = vector.broadcast %cst_118 : f32 to vector<10x64xf32>
    %339 = arith.mulf %338, %337 : vector<10x64xf32>
    %cst_119 = arith.constant 1.000000e+00 : f32
    %340 = vector.broadcast %cst_119 : f32 to vector<10x64xf32>
    %341 = arith.addf %340, %339 : vector<10x64xf32>
    %cst_120 = arith.constant 1.000000e+00 : f32
    %342 = vector.broadcast %cst_120 : f32 to vector<10x64xf32>
    %343 = arith.divf %342, %341 : vector<10x64xf32>
    %cst_121 = arith.constant 1.06140542 : f32
    %344 = vector.broadcast %cst_121 : f32 to vector<10x64xf32>
    %345 = arith.mulf %344, %343 : vector<10x64xf32>
    %cst_122 = arith.constant 1.45315206 : f32
    %346 = vector.broadcast %cst_122 : f32 to vector<10x64xf32>
    %347 = arith.subf %345, %346 : vector<10x64xf32>
    %348 = arith.mulf %347, %343 : vector<10x64xf32>
    %cst_123 = arith.constant 1.42141378 : f32
    %349 = vector.broadcast %cst_123 : f32 to vector<10x64xf32>
    %350 = arith.addf %348, %349 : vector<10x64xf32>
    %351 = arith.mulf %350, %343 : vector<10x64xf32>
    %cst_124 = arith.constant 0.284496725 : f32
    %352 = vector.broadcast %cst_124 : f32 to vector<10x64xf32>
    %353 = arith.subf %351, %352 : vector<10x64xf32>
    %354 = arith.mulf %353, %343 : vector<10x64xf32>
    %cst_125 = arith.constant 0.254829586 : f32
    %355 = vector.broadcast %cst_125 : f32 to vector<10x64xf32>
    %356 = arith.addf %354, %355 : vector<10x64xf32>
    %357 = arith.mulf %356, %343 : vector<10x64xf32>
    %358 = arith.mulf %336, %336 : vector<10x64xf32>
    %cst_126 = arith.constant 0.000000e+00 : f32
    %359 = vector.broadcast %cst_126 : f32 to vector<10x64xf32>
    %360 = arith.subf %359, %358 : vector<10x64xf32>
    %361 = math.exp %360 : vector<10x64xf32>
    %362 = arith.mulf %357, %361 : vector<10x64xf32>
    %cst_127 = arith.constant 1.000000e+00 : f32
    %363 = vector.broadcast %cst_127 : f32 to vector<10x64xf32>
    %364 = arith.subf %363, %362 : vector<10x64xf32>
    %cst_128 = arith.constant 0.000000e+00 : f32
    %365 = vector.broadcast %cst_128 : f32 to vector<10x64xf32>
    %366 = arith.cmpf oge, %336, %365 : vector<10x64xf32>
    %cst_129 = arith.constant 0.000000e+00 : f32
    %367 = vector.broadcast %cst_129 : f32 to vector<10x64xf32>
    %368 = arith.subf %367, %364 : vector<10x64xf32>
    %369 = arith.select %366, %364, %368 : vector<10x64xi1>, vector<10x64xf32>
    %cst_130 = arith.constant 1.000000e+00 : f32
    %370 = vector.broadcast %cst_130 : f32 to vector<10x64xf32>
    %371 = arith.addf %370, %369 : vector<10x64xf32>
    %372 = arith.mulf %334, %371 : vector<10x64xf32>
    %373 = arith.truncf %372 : vector<10x64xf32> to vector<10x64xbf16>
    %cst_131 = arith.constant dense<0.000000e+00> : vector<10x32xf32>
    %374 = tpu.matmul %373, %206, %cst_131 {dimension_numbers = #tpu.dot_dimension_numbers<[1], [0], [0], [1], [0, 0, 1, 1], [], []>} : vector<10x64xbf16>, vector<64x32xbf16>, vector<10x32xf32> -> vector<10x32xf32>
    %375 = arith.addf %308, %374 : vector<10x32xf32>
    %376 = vector.broadcast %199 : vector<1x32xf32> to vector<10x32xf32>
    %377 = arith.addf %375, %376 : vector<10x32xf32>
    %c26 = arith.constant 26 : index
    %c0_132 = arith.constant 0 : index
    %378 = vector.load %arg5[%c26, %c0_132] : memref<41x96xf32, #tpu.memory_space<vmem>>, vector<1x32xf32>
    %c27 = arith.constant 27 : index
    %c0_133 = arith.constant 0 : index
    %379 = vector.load %arg5[%c27, %c0_133] : memref<41x96xf32, #tpu.memory_space<vmem>>, vector<1x32xf32>
    %c28 = arith.constant 28 : index
    %c0_134 = arith.constant 0 : index
    %380 = vector.load %arg5[%c28, %c0_134] : memref<41x96xf32, #tpu.memory_space<vmem>>, vector<2x32xf32>
    %c30 = arith.constant 30 : index
    %c0_135 = arith.constant 0 : index
    %381 = vector.load %arg5[%c30, %c0_135] : memref<41x96xf32, #tpu.memory_space<vmem>>, vector<1x2xf32>
    %382 = vector.extract_strided_slice %377 {offsets = [0, 0], sizes = [1, 32], strides = [1, 1]} : vector<10x32xf32> to vector<1x32xf32>
    %383 = vector.extract_strided_slice %377 {offsets = [5, 0], sizes = [1, 32], strides = [1, 1]} : vector<10x32xf32> to vector<1x32xf32>
    %384 = tpu.concatenate %382, %383 in 0 : vector<1x32xf32>, vector<1x32xf32> -> vector<2x32xf32>
    %cst_136 = arith.constant dense<0.000000e+00> : vector<2xf32>
    %385 = vector.multi_reduction <add>, %384, %cst_136 [1] : vector<2x32xf32> to vector<2xf32>
    %386 = vector.shape_cast %385 : vector<2xf32> to vector<2x1xf32>
    %cst_137 = arith.constant 3.200000e+01 : f32
    %387 = vector.broadcast %cst_137 : f32 to vector<2x1xf32>
    %388 = arith.divf %386, %387 : vector<2x1xf32>
    %389 = vector.broadcast %388 : vector<2x1xf32> to vector<2x32xf32>
    %390 = arith.subf %384, %389 : vector<2x32xf32>
    %391 = arith.mulf %390, %390 : vector<2x32xf32>
    %cst_138 = arith.constant dense<0.000000e+00> : vector<2xf32>
    %392 = vector.multi_reduction <add>, %391, %cst_138 [1] : vector<2x32xf32> to vector<2xf32>
    %393 = vector.shape_cast %392 : vector<2xf32> to vector<2x1xf32>
    %cst_139 = arith.constant 3.200000e+01 : f32
    %394 = vector.broadcast %cst_139 : f32 to vector<2x1xf32>
    %395 = arith.divf %393, %394 : vector<2x1xf32>
    %cst_140 = arith.constant 9.99999997E-7 : f32
    %396 = vector.broadcast %cst_140 : f32 to vector<2x1xf32>
    %397 = arith.addf %395, %396 : vector<2x1xf32>
    %398 = math.rsqrt %397 : vector<2x1xf32>
    %399 = vector.broadcast %398 : vector<2x1xf32> to vector<2x32xf32>
    %400 = arith.mulf %390, %399 : vector<2x32xf32>
    %401 = vector.broadcast %378 : vector<1x32xf32> to vector<2x32xf32>
    %402 = arith.mulf %400, %401 : vector<2x32xf32>
    %403 = vector.broadcast %379 : vector<1x32xf32> to vector<2x32xf32>
    %404 = arith.addf %402, %403 : vector<2x32xf32>
    %cst_141 = arith.constant dense<0.000000e+00> : vector<2x2xf32>
    %405 = tpu.matmul %404, %380, %cst_141 {dimension_numbers = #tpu.dot_dimension_numbers<[1], [1], [0], [0], [0, 0, 1, 0], [], []>} : vector<2x32xf32>, vector<2x32xf32>, vector<2x2xf32> -> vector<2x2xf32>
    %406 = vector.broadcast %381 : vector<1x2xf32> to vector<2x2xf32>
    %407 = arith.addf %405, %406 : vector<2x2xf32>
    %c0_142 = arith.constant 0 : index
    %c0_143 = arith.constant 0 : index
    %408 = vector.load %arg7[%c0_142, %c0_143] : memref<2x2xf32, #tpu.memory_space<vmem>>, vector<2x2xf32>
    tpu.vector_store %arg7[%c0_142, %c0_143], %407 {strides = array<i32>} : memref<2x2xf32, #tpu.memory_space<vmem>>, vector<2x2xf32>,
    %409 = tpu.iota {dimensions = array<i32: 1>} : vector<1x2xi32>
    %cst_144 = arith.constant 0.000000e+00 : f32
    %410 = vector.broadcast %cst_144 : f32 to vector<1x1xf32>
    %411 = vector.extract_strided_slice %407 {offsets = [0, 0], sizes = [1, 2], strides = [1, 1]} : vector<2x2xf32> to vector<1x2xf32>
    %cst_145 = arith.constant dense<0xFF800000> : vector<1xf32>
    %412 = vector.multi_reduction <maximumf>, %411, %cst_145 [1] : vector<1x2xf32> to vector<1xf32>
    %413 = vector.shape_cast %412 : vector<1xf32> to vector<1x1xf32>
    %414 = vector.broadcast %413 : vector<1x1xf32> to vector<1x2xf32>
    %415 = arith.subf %411, %414 : vector<1x2xf32>
    %416 = math.exp %415 : vector<1x2xf32>
    %cst_146 = arith.constant dense<0.000000e+00> : vector<1xf32>
    %417 = vector.multi_reduction <add>, %416, %cst_146 [1] : vector<1x2xf32> to vector<1xf32>
    %418 = vector.shape_cast %417 : vector<1xf32> to vector<1x1xf32>
    %419 = math.log %418 : vector<1x1xf32>
    %420 = arith.addf %419, %413 : vector<1x1xf32>
    %c0_147 = arith.constant 0 : index
    %421 = memref.load %arg0[%c0_147] : memref<2xi32, #tpu.memory_space<smem>>
    %422 = vector.broadcast %421 : i32 to vector<1x2xi32>
    %423 = arith.cmpi eq, %409, %422 : vector<1x2xi32>
    %424 = arith.extui %423 : vector<1x2xi1> to vector<1x2xi32>
    %425 = arith.sitofp %424 : vector<1x2xi32> to vector<1x2xf32>
    %426 = arith.mulf %411, %425 : vector<1x2xf32>
    %cst_148 = arith.constant dense<0.000000e+00> : vector<1xf32>
    %427 = vector.multi_reduction <add>, %426, %cst_148 [1] : vector<1x2xf32> to vector<1xf32>
    %428 = vector.shape_cast %427 : vector<1xf32> to vector<1x1xf32>
    %429 = arith.subf %420, %428 : vector<1x1xf32>
    %430 = arith.addf %410, %429 : vector<1x1xf32>
    %431 = vector.extract_strided_slice %407 {offsets = [1, 0], sizes = [1, 2], strides = [1, 1]} : vector<2x2xf32> to vector<1x2xf32>
    %cst_149 = arith.constant dense<0xFF800000> : vector<1xf32>
    %432 = vector.multi_reduction <maximumf>, %431, %cst_149 [1] : vector<1x2xf32> to vector<1xf32>
    %433 = vector.shape_cast %432 : vector<1xf32> to vector<1x1xf32>
    %434 = vector.broadcast %433 : vector<1x1xf32> to vector<1x2xf32>
    %435 = arith.subf %431, %434 : vector<1x2xf32>
    %436 = math.exp %435 : vector<1x2xf32>
    %cst_150 = arith.constant dense<0.000000e+00> : vector<1xf32>
    %437 = vector.multi_reduction <add>, %436, %cst_150 [1] : vector<1x2xf32> to vector<1xf32>
    %438 = vector.shape_cast %437 : vector<1xf32> to vector<1x1xf32>
    %439 = math.log %438 : vector<1x1xf32>
    %440 = arith.addf %439, %433 : vector<1x1xf32>
    %c1_151 = arith.constant 1 : index
    %441 = memref.load %arg0[%c1_151] : memref<2xi32, #tpu.memory_space<smem>>
    %442 = vector.broadcast %441 : i32 to vector<1x2xi32>
    %443 = arith.cmpi eq, %409, %442 : vector<1x2xi32>
    %444 = arith.extui %443 : vector<1x2xi1> to vector<1x2xi32>
    %445 = arith.sitofp %444 : vector<1x2xi32> to vector<1x2xf32>
    %446 = arith.mulf %431, %445 : vector<1x2xf32>
    %cst_152 = arith.constant dense<0.000000e+00> : vector<1xf32>
    %447 = vector.multi_reduction <add>, %446, %cst_152 [1] : vector<1x2xf32> to vector<1xf32>
    %448 = vector.shape_cast %447 : vector<1xf32> to vector<1x1xf32>
    %449 = arith.subf %440, %448 : vector<1x1xf32>
    %450 = arith.addf %430, %449 : vector<1x1xf32>
    %cst_153 = arith.constant 5.000000e-01 : f32
    %451 = vector.broadcast %cst_153 : f32 to vector<1x1xf32>
    %452 = arith.mulf %450, %451 : vector<1x1xf32>
    %c0_154 = arith.constant 0 : index
    %c0_155 = arith.constant 0 : index
    %453 = vector.load %arg6[%c0_154, %c0_155] : memref<1x1xf32, #tpu.memory_space<vmem>>, vector<1x1xf32>
    tpu.vector_store %arg6[%c0_154, %c0_155], %452 {strides = array<i32>} : memref<1x1xf32, #tpu.memory_space<vmem>>, vector<1x1xf32>,
    return
  }
}

</mosaic_0001>

<bundles_post_ra>
// kernel: crisis_vit_pretrain_binary.1
= control target key start
LH: loop header
LB: loop body
LE: loop exit
PB: predicated region body
PF: predicated region fallthrough
CT: control target
= control target key end

     0   :  { %13 = vsyncpa [#allocation4], 0  ;;  %s2987_s0 = inlined_call_operand.vmem [shape: s32[2], index: 0, kind: input, shape index: {}]   ;;  %s2988_s1 = inlined_call_operand.vmem [shape: bf16[10,192], index: 1, kind: input, shape index: {}]   ;;  %s2989_s2 = inlined_call_operand.vmem [shape: bf16[192,32], index: 2, kind: input, shape index: {}]   ;;  %s2990_s3 = inlined_call_operand.vmem [shape: bf16[2,32,192], index: 3, kind: input, shape index: {}]   ;;  %s2991_s4 = inlined_call_operand.vmem [shape: bf16[2,64,32], index: 4, kind: input, shape index: {}]   ;;  %s2992_s5 = inlined_call_operand.vmem [shape: f32[41,96], index: 5, kind: input, shape index: {}]   ;;  %s2993_s6 = inlined_call_operand.hbm [shape: f32[1,1], index: 6, kind: output, shape index: {0}]   ;;  %s2994_s7 = inlined_call_operand.hbm [shape: f32[2,2], index: 7, kind: output, shape index: {1}]  }
   0x1   :  { %14 = vsyncpa [#allocation3], 0 }
   0x2   :  { %15 = vsyncpa [#allocation7], 0  ;;  %s21_s26 = sshll.u32 %s2987_s0, 4  ;;  %s2344_s27 = smov [#allocation2]   ;;  %s22_s26 = int_to_ptr.vmem [resolvable:$true] %s21_s26 }
   0x3   :  { %24 = dma.vmem_to_smem %s22_s26, 16, %s2344_s27, [#allocation4]  }
   0x4   :  { %2338 = dma.done.wait [#allocation4], 16  }
   0x5   :  { %2339 = vsyncadd [#allocation4], 4294967280 }
   0x6   :  { %39 = sfence }
   0x7   :  { %v2078_v0 = vld [vmem:[%s2989_s2 + $0x38] sm:$0xff]  ;;  %v2077_v2 = vld [vmem:[%s2989_s2 + $0x30] sm:$0xff]  ;;  %v2076_v4 = vld [vmem:[%s2989_s2 + $0x28] sm:$0xff]  ;;  %vm152_vm0 = vcmask 523264   ;;  %vm204_vm1 = vcmask 261120   ;;  %vm208_vm2 = vcmask 254976  }
   0x8   :  { %v2082_v1 = vld [vmem:[%s2989_s2 + $0x58] sm:$0xff]  ;;  %156 = vmatpush.bf16.msra.mxu0 %v2078_v0  ;;  %v2081_v3 = vld [vmem:[%s2989_s2 + $0x50] sm:$0xff]  ;;  %v2080_v5 = vld [vmem:[%s2989_s2 + $0x48] sm:$0xff]  ;;  %v2345_v30 = vmov 32.0   ;;  %s2346_s28 = smov 64   ;;  %s2347_s29 = smov 96  }
   0x9   :  { %174 = vmatpush.bf16.msra.mxu1 %v2082_v1  ;;  %v2075_v6 = vld [vmem:[%s2989_s2 + $0x20] sm:$0xff]  ;;  %v1863_v9 = vld [vmem:[%s2988_s1 + $0x8] sm:$0x10]  ;;  %v2074_v10 = vld [vmem:[%s2989_s2 + $0x18] sm:$0xff]  ;;  %2168 = vrcp.f32 %v2345_v30  ;;  %s2348_s30 = smov 120   ;;  %s2349_s8 = smov 80  }
   0xa   :  { %v2079_v7 = vld [vmem:[%s2989_s2 + $0x40] sm:$0xff]  ;;  %v2073_v12 = vld [vmem:[%s2989_s2 + $0x10] sm:$0xff]  ;;  %v2072_v13 = vld [vmem:[%s2989_s2 + $0x8] sm:$0xff]  ;;  %vm302_vm10 = vcmask 64512   ;;  %vm336_vm11 = vcmask 80896   ;;  %vm340_vm12 = vcmask 74752  }
   0xb   :  { %v2069_v8 = vld [vmem:[%s2988_s1 + $0x4] sm:$0xf]  ;;  %v1861_v15 = vld [vmem:[%s2988_s1] sm:$0xf]  ;;  %v2070_v16 = vld [vmem:[%s2988_s1 + $0x4] sm:$0x10] }
   0xc   :  { %157 = vmatpush.bf16.msra.mxu0 %v2077_v2  ;;  %v1866_v11 = vor.u32 %v2069_v8, %v1863_v9  ;;  %v2071_v14 = vld [vmem:[%s2989_s2] sm:$0xff]  ;;  %v1862_v17 = vor.u32 %v2070_v16, %v1861_v15  ;;  %v41_v18 = vld [vmem:[%s2992_s5 + $0x10] sm:$0xff]  ;;  %v42_v24 = vld [vmem:[%s2992_s5 + $0x18] sm:$0x3]  ;;  %s2350_s12 = smov 88   ;;  %s2351_s13 = smov 72  }
   0xd   :  { %175 = vmatpush.bf16.msra.mxu1 %v2081_v3  ;;  %v1922_v47 = vld [vmem:[%s2990_s3 + $0x10] sm:$0xf]  ;;  %v2086_v48 = vld [vmem:[%s2990_s3 + $0x14] sm:$0xf0]  ;;  %v1918_v50 = vld [vmem:[%s2990_s3] sm:$0xf] }
   0xe   :  { %v2484_v49 = vor.u32 %v2086_v48, %v1922_v47  ;;  %v2084_v51 = vld [vmem:[%s2990_s3 + $0x4] sm:$0xf0]  ;;  %v2149_v8 = vld [vmem:[%s2992_s5] ss:$0 sm:$0xff]  ;;  %s2352_s2 = smov 112   ;;  %s2353_s14 = smov 104  }
   0xf   :  { %v2169_v31 = vpop.eup %2168  ;;  %v2493_v53 = vor.u32 %v2084_v51, %v1918_v50  ;;  %vm371_vm13 = vcmask 1041408   ;;  %s2354_s1 = smov 56   ;;  %s2355_s15 = smov 48   ;;  %vm714_vm14 = vcmask 130048   ;;  %vm717_vm15 = vcmask 195584  }
  0x10   :  { %158 = vmatpush.bf16.msra.mxu0 %v2076_v4  ;;  %v213_v32 = vmul.f32 32.0, %v2169_v31  ;;  %vm217_vm3 = vweird.f32 %v2169_v31  ;;  %286 = vmatpush.bf16.msra.mxu2 %v2484_v49  ;;  %s2356_s16 = smov 40   ;;  %s2357_s17 = smov 8  }
  0x11   :  { %176 = vmatpush.bf16.msra.mxu1 %v2080_v5  ;;  %s2358_s18 = smov 32   ;;  %s2359_s19 = smov 16  }
  0x12   :  { %v214_v33 = vsub.f32 1.0, %v213_v32  ;;  %s2360_s20 = smov 24   ;;  %s2363_s9 = smov [#allocation5]  }
  0x13   :  { %s1833_s11 = sshll.u32 %s2993_s6, 4  ;;  %s1834_s11 = int_to_ptr.hbm [resolvable:$true] %s1833_s11 }
  0x14   :  { %159 = vmatpush.bf16.msra.mxu0 %v2075_v6  ;;  %v215_v34 = vmul.f32 %v2169_v31, %v214_v33  ;;  %287 = vmatpush.bf16.msra.mxu2 %v2493_v53  ;;  %v2542_v33 = vld [vmem:[%s2992_s5 + $0x27] sm:$0x3] }
  0x15   :  { %177 = vmatpush.bf16.msra.mxu1 %v2079_v7 }
  0x16   :  { %v216_v35 = vadd.f32 %v2169_v31, %v215_v34 }
  0x18   :  { %160 = vmatpush.bf16.msra.mxu0 %v2074_v10  ;;  %1915 = vmatmul.msk.bf16.vlgmr.msra.gmra.mxu1 %vm152_vm0, %v1866_v11  ;;  %v2470_v36 = vsel %vm217_vm3, %v2169_v31, %v216_v35 }
  0x1c   :  { %161 = vmatpush.bf16.msra.mxu0 %v2073_v12 }
  0x20   :  { %162 = vmatpush.bf16.msra.mxu0 %v2072_v13  ;;  %v2150_v13 = vld [vmem:[%s2992_s5 + $0x1] ss:$0 sm:$0xff] }
  0x24   :  { %163 = vmatpush.bf16.msra.mxu0 %v2071_v14 }
  0x27   :  { %164 = vmatmul.bf16.vlgmr.msra.gmra.mxu0 %v1862_v17 }
  0x95   :  { %v179_v19 = vpop.f32.mrf.mxu1 }
  0x9d   :  { %v181_v27 = vpop.f32.mrf.mxu1 }
  0xa4   :  { %v165_v20 = vpop.f32.mrf.mxu0 }
  0xa5   :  { %v166_v21 = vadd.f32 %v165_v20, %v41_v18  ;;  %v2151_v18 = vld [vmem:[%s2992_s5 + $0x2] ss:$0 sm:$0xff] }
  0xa7   :  { %v2459_v22 = vadd.f32 %v179_v19, %v166_v21 }
  0xa9   :  { %v205_v23 = vsel %vm204_vm1, %v2459_v22, 0.0 }
  0xaa   :  { %206 = vadd.xlane.f32.xlu0 %v205_v23 }
  0xac   :  { %v167_v25 = vpop.f32.mrf.mxu0 }
  0xad   :  { %v168_v26 = vadd.f32 %v167_v25, %v42_v24 }
  0xaf   :  { %v2466_v28 = vadd.f32 %v181_v27, %v168_v26 }
  0xb1   :  { %v209_v29 = vsel %vm208_vm2, %v2466_v28, 0.0 }
  0xb2   :  { %210 = vadd.xlane.f32.xlu0 %v209_v29  ;;  %v2535_v29 = vld [vmem:[%s2992_s5 + $0x1f] sm:$0xff] }
 0x11d   :  { %v207_v37 = vpop.xlane.xlu0 %206 }
 0x11e   :  { %v219_v38 = vmul.f32 %v2470_v36, %v207_v37 }
 0x120   :  { %v221_v39 = vsub.f32 %v2459_v22, %v219_v38 }
 0x122   :  { %v223_v40 = vmul.f32 %v221_v39, %v221_v39 }
 0x124   :  { %v225_v41 = vsel %vm204_vm1, %v223_v40, 0.0 }
 0x125   :  { %226 = vadd.xlane.f32.xlu1 %v225_v41  ;;  %v211_v42 = vpop.xlane.xlu0 %210 }
 0x126   :  { %v220_v43 = vmul.f32 %v2470_v36, %v211_v42 }
 0x128   :  { %v222_v44 = vsub.f32 %v2466_v28, %v220_v43 }
 0x12a   :  { %v224_v45 = vmul.f32 %v222_v44, %v222_v44 }
 0x12c   :  { %v228_v46 = vsel %vm208_vm2, %v224_v45, 0.0 }
 0x12d   :  { %229 = vadd.xlane.f32.xlu1 %v228_v46 }
 0x198   :  { %v227_v52 = vpop.xlane.xlu1 %226 }
 0x199   :  { %v231_v54 = vmul.f32 %v227_v52, %v2470_v36 }
 0x19b   :  { %v233_v55 = vadd.f32 1e-06, %v231_v54 }
 0x19d   :  { %2170 = vrsqrt.f32 %v233_v55  ;;  %vm241_vm5 = vweird.f32 %v233_v55 }
 0x1a0   :  { %v230_v56 = vpop.xlane.xlu1 %229 }
 0x1a1   :  { %v232_v57 = vmul.f32 %v230_v56, %v2470_v36 }
 0x1a3   :  { %v2171_v58 = vpop.eup %2170  ;;  %v234_v59 = vadd.f32 1e-06, %v232_v57 }
 0x1a4   :  { %v236_v60 = vmul.f32 %v2171_v58, %v233_v55  ;;  %vm242_vm4 = vweird.f32 %v2171_v58 }
 0x1a5   :  { %2172 = vrsqrt.f32 %v234_v59  ;;  %vm243_vm6 = vmor %vm241_vm5, %vm242_vm4  ;;  %vm251_vm8 = vweird.f32 %v234_v59 }
 0x1a6   :  { %v237_v61 = vmul.f32 %v2171_v58, %v236_v60 }
 0x1a8   :  { %v238_v62 = vmul.f32 0.5, %v237_v61 }
 0x1aa   :  { %v239_v63 = vsub.f32 1.5, %v238_v62 }
 0x1ab   :  { %v2173_v0 = vpop.eup %2172 }
 0x1ac   :  { %v240_v1 = vmul.f32 %v2171_v58, %v239_v63  ;;  %v246_v2 = vmul.f32 %v2173_v0, %v234_v59  ;;  %vm252_vm7 = vweird.f32 %v2173_v0 }
 0x1ad   :  { %vm253_vm9 = vmor %vm251_vm8, %vm252_vm7 }
 0x1ae   :  { %v247_v3 = vmul.f32 %v2173_v0, %v246_v2  ;;  %v244_v4 = vsel %vm243_vm6, %v2171_v58, %v240_v1 }
 0x1af   :  { %v255_v7 = vmul.f32 %v244_v4, %v221_v39 }
 0x1b0   :  { %v248_v5 = vmul.f32 0.5, %v247_v3 }
 0x1b1   :  { %v258_v12 = vmul.f32 %v2149_v8, %v255_v7 }
 0x1b2   :  { %v249_v6 = vsub.f32 1.5, %v248_v5 }
 0x1b3   :  { %v261_v15 = vadd.f32 %v2150_v13, %v258_v12 }
 0x1b4   :  { %v250_v9 = vmul.f32 %v2173_v0, %v249_v6 }
 0x1b6   :  { %v254_v10 = vsel %vm253_vm9, %v2173_v0, %v250_v9 }
 0x1b7   :  { %v256_v11 = vmul.f32 %v254_v10, %v222_v44 }
 0x1b9   :  { %v259_v14 = vmul.f32 %v2149_v8, %v256_v11 }
 0x1bb   :  { %v262_v16 = vadd.f32 %v2150_v13, %v259_v14 }
 0x1bd   :  { %v263_v17 = vpack.c.bf16 %v262_v16, %v261_v15 }
 0x1bf   :  { %1924 = vmatmul.msk.bf16.vlgmr.msra.gmra.mxu2 %vm204_vm1, %v263_v17 }
 0x242   :  { %v289_v19 = vpop.f32.mrf.mxu2 }
 0x243   :  { %v2508_v20 = vadd.f32 %v2151_v18, %v289_v19 }
 0x245   :  { %360 = vrot.lane.b32.xlu1 %v2508_v20, %s2346_s28  ;;  %v2515_v24 = vmul.f32 0.35355338, %v2508_v20 }
 0x24a   :  { %v291_v21 = vpop.f32.mrf.mxu2 }
 0x24b   :  { %v2512_v23 = vadd.f32 %v2151_v18, %v291_v21 }
 0x24d   :  { %300 = vrot.lane.b32.xlu2 %v2512_v23, %s2347_s29  ;;  %397 = vrot.lane.b32.xlu1 %v2515_v24, %s2348_s30  ;;  %v295_v25 = vmul.f32 0.35355338, %v2512_v23 }
 0x255   :  { %298 = vrot.lane.b32.xlu2 %v2508_v20, %s2347_s29  ;;  %399 = vrot.lane.b32.xlu1 %v295_v25, %s2348_s30 }
 0x25d   :  { %500 = vrot.lane.b32.xlu2 %v2512_v23, %s2349_s8 }
 0x2a7   :  { %v301_v26 = vpop.permute.xlu2 %300 }
 0x2a8   :  { %1925 = vmatpush.xpose.msk.msra.mxu3 %vm302_vm10, %v301_v26 }
 0x2af   :  { %v299_v27 = vpop.permute.xlu2 %298 }
 0x2b0   :  { %1926 = vmatpush.xpose.msk.msra.mxu3 %vm302_vm10, %v299_v27 }
 0x2b3   :  { %1927 = vmatmul.msk.f32.vlgmr.msra.gmra.mxu3 %vm302_vm10, %v2515_v24 }
 0x2b7   :  { %v361_v38 = vpop.permute.xlu1 %360  ;;  %v501_v54 = vpop.permute.xlu2 %500 }
 0x2bb   :  { %1928 = vmatmul.msk.f32.gmra.mxu3 %vm302_vm10, %v295_v25 }
 0x2bf   :  { %v398_v39 = vpop.permute.xlu1 %397 }
 0x2c7   :  { %v400_v40 = vpop.permute.xlu1 %399 }
 0x336   :  { %v330_v30 = vpop.f32.mrf.mxu3 }
 0x337   :  { %v331_v31 = vadd.f32 %v330_v30, %v2535_v29 }
 0x339   :  { %v337_v32 = vsel %vm336_vm11, %v331_v31, -inf }
 0x33a   :  { %338 = vmax.xlane.f32.xlu0 %v337_v32 }
 0x33e   :  { %v333_v34 = vpop.f32.mrf.mxu3 }
 0x33f   :  { %v334_v35 = vadd.f32 %v333_v34, %v2542_v33 }
 0x341   :  { %v341_v37 = vsel %vm340_vm12, %v334_v35, -inf }
 0x342   :  { %342 = vmax.xlane.f32.xlu1 %v341_v37 }
 0x34e   :  { %362 = vrot.lane.b32.xlu0 %v2512_v23, %s2346_s28 }
 0x356   :  { %403 = vrot.lane.b32.xlu0 %v2512_v23, %s2350_s12 }
 0x35b   :  { %597 = vrot.lane.b32.xlu1 %v2512_v23, %s2351_s13 }
 0x35e   :  { %401 = vrot.lane.b32.xlu0 %v2508_v20, %s2350_s12 }
 0x366   :  { %498 = vrot.lane.b32.xlu0 %v2508_v20, %s2349_s8 }
 0x36e   :  { %494 = vrot.lane.b32.xlu0 %v2515_v24, %s2352_s2 }
 0x376   :  { %496 = vrot.lane.b32.xlu0 %v295_v25, %s2352_s2 }
 0x37e   :  { %593 = vrot.lane.b32.xlu0 %v295_v25, %s2353_s14 }
 0x3ad   :  { %v339_v41 = vpop.xlane.xlu0 %338 }
 0x3ae   :  { %v344_v42 = vsub.f32 %v331_v31, %v339_v41 }
 0x3b0   :  { %v346_v43 = vmul.f32 1.442695, %v344_v42 }
 0x3b2   :  { %2174 = vpow2.f32 %v346_v43 }
 0x3b5   :  { %v343_v44 = vpop.xlane.xlu1 %342 }
 0x3b6   :  { %v345_v45 = vsub.f32 %v334_v35, %v343_v44 }
 0x3b8   :  { %v2175_v46 = vpop.eup %2174  ;;  %v348_v47 = vmul.f32 1.442695, %v345_v45 }
 0x3b9   :  { %v350_v48 = vsel %vm336_vm11, %v2175_v46, 0.0 }
 0x3ba   :  { %2176 = vpow2.f32 %v348_v47  ;;  %351 = vadd.xlane.f32.xlu2 %v350_v48 }
 0x3c0   :  { %v2177_v50 = vpop.eup %2176  ;;  %v363_v51 = vpop.permute.xlu0 %362 }
 0x3c1   :  { %1929 = vmatpush.msk.msrb.mxu2 %vm371_vm13, %v363_v51  ;;  %v353_v52 = vsel %vm340_vm12, %v2177_v50, 0.0 }
 0x3c2   :  { %354 = vadd.xlane.f32.xlu1 %v353_v52 }
 0x3c3   :  { %389 = vmatpush.msrb.mxu2 %v361_v38 }
 0x3c5   :  { %1939 = vmatpush.xpose.msk.msra.mxu2 %vm302_vm10, %v501_v54 }
 0x3c8   :  { %v404_v55 = vpop.permute.xlu0 %403 }
 0x3c9   :  { %1932 = vmatpush.xpose.msk.msrb.mxu3 %vm302_vm10, %v404_v55 }
 0x3cd   :  { %v598_v56 = vpop.permute.xlu1 %597 }
 0x3ce   :  { %1946 = vmatpush.xpose.msk.msrb.mxu0 %vm302_vm10, %v598_v56 }
 0x3d0   :  { %v402_v57 = vpop.permute.xlu0 %401 }
 0x3d1   :  { %1933 = vmatpush.xpose.msk.msrb.mxu3 %vm302_vm10, %v402_v57 }
 0x3d2   :  { %591 = vrot.lane.b32.xlu2 %v2515_v24, %s2353_s14 }
 0x3d4   :  { %1934 = vmatmul.msk.f32.vlgmr.msrb.gmra.mxu3 %vm302_vm10, %v398_v39 }
 0x3d8   :  { %v499_v58 = vpop.permute.xlu0 %498 }
 0x3d9   :  { %1940 = vmatpush.xpose.msk.msra.mxu2 %vm302_vm10, %v499_v58 }
 0x3db   :  { %595 = vrot.lane.b32.xlu1 %v2508_v20, %s2351_s13 }
 0x3dc   :  { %1935 = vmatmul.msk.f32.gmra.mxu3 %vm302_vm10, %v400_v40 }
 0x3e0   :  { %v495_v1 = vpop.permute.xlu0 %494 }
 0x3e8   :  { %v497_v3 = vpop.permute.xlu0 %496 }
 0x3f0   :  { %v594_v6 = vpop.permute.xlu0 %593 }
 0x42d   :  { %v352_v59 = vpop.xlane.xlu2 %351 }
 0x42e   :  { %2178 = vrcp.f32 %v352_v59 }
 0x434   :  { %v2179_v60 = vpop.eup %2178 }
 0x435   :  { %v355_v61 = vpop.xlane.xlu1 %354  ;;  %v358_v62 = vmul.f32 %v2179_v60, %v2175_v46  ;;  %v592_v4 = vpop.permute.xlu2 %591 }
 0x436   :  { %2180 = vrcp.f32 %v355_v61 }
 0x437   :  { %1930 = vmatmul.msk.f32.vlgmr.msrb.gmra.mxu2 %vm336_vm11, %v358_v62 }
 0x43c   :  { %v2181_v63 = vpop.eup %2180 }
 0x43d   :  { %v359_v0 = vmul.f32 %v2181_v63, %v2177_v50 }
 0x43f   :  { %1931 = vmatmul.msk.f32.gmra.mxu2 %vm336_vm11, %v359_v0 }
 0x447   :  { %1941 = vmatmul.msk.f32.vlgmr.msra.gmra.mxu2 %vm302_vm10, %v495_v1 }
 0x44d   :  { %v596_v2 = vpop.permute.xlu1 %595 }
 0x44e   :  { %1947 = vmatpush.xpose.msk.msrb.mxu0 %vm302_vm10, %v596_v2 }
 0x44f   :  { %1942 = vmatmul.msk.f32.gmra.mxu2 %vm302_vm10, %v497_v3 }
 0x451   :  { %1948 = vmatmul.msk.f32.vlgmr.msrb.gmra.mxu0 %vm302_vm10, %v592_v4 }
 0x457   :  { %v430_v5 = vpop.f32.mrf.mxu3 }
 0x458   :  { %v431_v7 = vadd.f32 %v430_v5, %v2535_v29 }
 0x459   :  { %1949 = vmatmul.msk.f32.gmra.mxu0 %vm302_vm10, %v594_v6 }
 0x45a   :  { %v436_v8 = vsel %vm336_vm11, %v431_v7, -inf }
 0x45b   :  { %437 = vmax.xlane.f32.xlu1 %v436_v8 }
 0x45f   :  { %v433_v9 = vpop.f32.mrf.mxu3 }
 0x460   :  { %v434_v10 = vadd.f32 %v433_v9, %v2542_v33 }
 0x462   :  { %v439_v11 = vsel %vm340_vm12, %v434_v10, -inf }
 0x463   :  { %440 = vmax.xlane.f32.xlu2 %v439_v11 }
 0x4ba   :  { %v2585_v12 = vpop.f32.mrf.mxu2 }
 0x4c2   :  { %v2587_v13 = vpop.f32.mrf.mxu2 }
 0x4ca   :  { %v527_v14 = vpop.f32.mrf.mxu2 }
 0x4cb   :  { %v528_v39 = vadd.f32 %v527_v14, %v2535_v29 }
 0x4cd   :  { %v533_v40 = vsel %vm336_vm11, %v528_v39, -inf }
 0x4ce   :  { %v624_v15 = vpop.f32.mrf.mxu0  ;;  %v438_v16 = vpop.xlane.xlu1 %437 }
 0x4cf   :  { %v625_v17 = vadd.f32 %v624_v15, %v2535_v29  ;;  %v442_v18 = vsub.f32 %v431_v7, %v438_v16 }
 0x4d1   :  { %v444_v19 = vmul.f32 1.442695, %v442_v18  ;;  %v630_v21 = vsel %vm336_vm11, %v625_v17, -inf }
 0x4d2   :  { %631 = vmax.xlane.f32.xlu2 %v630_v21  ;;  %v530_v24 = vpop.f32.mrf.mxu2 }
 0x4d3   :  { %2182 = vpow2.f32 %v444_v19  ;;  %v531_v25 = vadd.f32 %v530_v24, %v2542_v33 }
 0x4d5   :  { %v536_v26 = vsel %vm340_vm12, %v531_v25, -inf }
 0x4d6   :  { %v441_v27 = vpop.xlane.xlu2 %440  ;;  %537 = vmax.xlane.f32.xlu1 %v536_v26  ;;  %v627_v30 = vpop.f32.mrf.mxu0 }
 0x4d7   :  { %v2594_v31 = vadd.f32 %v627_v30, %v2542_v33  ;;  %v443_v32 = vsub.f32 %v434_v10, %v441_v27 }
 0x4d9   :  { %v2183_v34 = vpop.eup %2182  ;;  %v633_v35 = vsel %vm340_vm12, %v2594_v31, -inf  ;;  %v446_v38 = vmul.f32 1.442695, %v443_v32 }
 0x4da   :  { %634 = vmax.xlane.f32.xlu0 %v633_v35  ;;  %v448_v37 = vsel %vm336_vm11, %v2183_v34, 0.0 }
 0x4db   :  { %449 = vadd.xlane.f32.xlu2 %v448_v37  ;;  %2184 = vpow2.f32 %v446_v38 }
 0x4e1   :  { %v2185_v41 = vpop.eup %2184 }
 0x4e2   :  { %534 = vmax.xlane.f32.xlu0 %v533_v40  ;;  %v451_v33 = vsel %vm340_vm12, %v2185_v41, 0.0 }
 0x4ea   :  { %452 = vadd.xlane.f32.xlu0 %v451_v33 }
 0x4ef   :  { %460 = vrot.lane.b32.xlu1 %v2512_v23, %s2354_s1 }
 0x4f3   :  { %458 = vrot.lane.b32.xlu2 %v2508_v20, %s2354_s1 }
 0x4fe   :  { %557 = vrot.lane.b32.xlu0 %v2512_v23, %s2355_s15 }
 0x545   :  { %v632_v29 = vpop.xlane.xlu2 %631 }
 0x546   :  { %v636_v42 = vsub.f32 %v625_v17, %v632_v29 }
 0x548   :  { %v638_v43 = vmul.f32 1.442695, %v636_v42 }
 0x549   :  { %v538_v44 = vpop.xlane.xlu1 %537 }
 0x54a   :  { %2186 = vpow2.f32 %v638_v43  ;;  %v540_v45 = vsub.f32 %v531_v25, %v538_v44 }
 0x54c   :  { %v543_v46 = vmul.f32 1.442695, %v540_v45 }
 0x54d   :  { %v635_v47 = vpop.xlane.xlu0 %634 }
 0x54e   :  { %2188 = vpow2.f32 %v543_v46  ;;  %v450_v55 = vpop.xlane.xlu2 %449  ;;  %v637_v4 = vsub.f32 %v2594_v31, %v635_v47 }
 0x54f   :  { %2190 = vrcp.f32 %v450_v55 }
 0x550   :  { %v2187_v48 = vpop.eup %2186  ;;  %v640_v5 = vmul.f32 1.442695, %v637_v4 }
 0x551   :  { %v642_v50 = vsel %vm336_vm11, %v2187_v48, 0.0 }
 0x552   :  { %643 = vadd.xlane.f32.xlu1 %v642_v50 }
 0x554   :  { %v2189_v51 = vpop.eup %2188 }
 0x555   :  { %v535_v52 = vpop.xlane.xlu0 %534  ;;  %v548_v54 = vsel %vm340_vm12, %v2189_v51, 0.0  ;;  %v2191_v58 = vpop.eup %2190 }
 0x556   :  { %v539_v56 = vsub.f32 %v528_v39, %v535_v52  ;;  %549 = vadd.xlane.f32.xlu2 %v548_v54  ;;  %v459_v63 = vpop.permute.xlu2 %458  ;;  %v456_v0 = vmul.f32 %v2191_v58, %v2183_v34 }
 0x558   :  { %v541_v57 = vmul.f32 1.442695, %v539_v56 }
 0x55a   :  { %2192 = vpow2.f32 %v541_v57 }
 0x55d   :  { %v453_v59 = vpop.xlane.xlu0 %452 }
 0x55e   :  { %2194 = vrcp.f32 %v453_v59 }
 0x55f   :  { %2196 = vpow2.f32 %v640_v5 }
 0x560   :  { %v2193_v60 = vpop.eup %2192 }
 0x561   :  { %v461_v61 = vpop.permute.xlu1 %460  ;;  %v545_v62 = vsel %vm336_vm11, %v2193_v60, 0.0 }
 0x562   :  { %1936 = vmatpush.msk.msrb.mxu1 %vm371_vm13, %v461_v61  ;;  %546 = vadd.xlane.f32.xlu0 %v545_v62 }
 0x564   :  { %486 = vmatpush.msrb.mxu1 %v459_v63  ;;  %v2195_v1 = vpop.eup %2194 }
 0x565   :  { %1937 = vmatmul.msk.f32.vlgmr.msrb.gmra.mxu1 %vm336_vm11, %v456_v0  ;;  %v457_v2 = vmul.f32 %v2195_v1, %v2185_v41  ;;  %v2197_v6 = vpop.eup %2196 }
 0x566   :  { %v645_v7 = vsel %vm340_vm12, %v2197_v6, 0.0 }
 0x56b   :  { %652 = vrot.lane.b32.xlu1 %v2508_v20, %s2356_s16 }
 0x56d   :  { %1938 = vmatmul.msk.f32.gmra.mxu1 %vm336_vm11, %v457_v2 }
 0x56e   :  { %723 = vrot.lane.b32.xlu2 %v2484_v49, %s2358_s18 }
 0x570   :  { %v558_v3 = vpop.permute.xlu0 %557 }
 0x571   :  { %1943 = vmatpush.msk.msra.mxu3 %vm371_vm13, %v558_v3 }
 0x576   :  { %555 = vrot.lane.b32.xlu0 %v2508_v20, %s2355_s15 }
 0x57e   :  { %654 = vrot.lane.b32.xlu0 %v2512_v23, %s2356_s16 }
 0x5a8   :  { %646 = vadd.xlane.f32.xlu0 %v645_v7  ;;  %v1958_v7 = vld [vmem:[%s2990_s3 + $0x18] sm:$0xf0] }
 0x5c5   :  { %v644_v14 = vpop.xlane.xlu1 %643 }
 0x5c9   :  { %v550_v10 = vpop.xlane.xlu2 %549 }
 0x5d1   :  { %v724_v34 = vpop.permute.xlu2 %723 }
 0x5d2   :  { %736 = vmatpush.bf16.msrb.mxu2 %v724_v34 }
 0x5d5   :  { %v547_v8 = vpop.xlane.xlu0 %546 }
 0x5d6   :  { %2198 = vrcp.f32 %v547_v8 }
 0x5d7   :  { %2200 = vrcp.f32 %v550_v10 }
 0x5d8   :  { %2202 = vrcp.f32 %v644_v14  ;;  %v1954_v14 = vld [vmem:[%s2990_s3 + $0x8] sm:$0xf0] }
 0x5dc   :  { %v2199_v11 = vpop.eup %2198 }
 0x5dd   :  { %v553_v15 = vmul.f32 %v2199_v11, %v2193_v60  ;;  %v2201_v17 = vpop.eup %2200  ;;  %v653_v25 = vpop.permute.xlu1 %652  ;;  %v2083_v11 = vld [vmem:[%s2990_s3 + $0x4] sm:$0xf] }
 0x5de   :  { %v2203_v18 = vpop.eup %2202  ;;  %v554_v21 = vmul.f32 %v2201_v17, %v2189_v51 }
 0x5df   :  { %v650_v24 = vmul.f32 %v2203_v18, %v2187_v48 }
 0x5e2   :  { %v488_v9 = vpop.f32.mrf.mxu1 }
 0x5e8   :  { %v556_v20 = vpop.permute.xlu0 %555 }
 0x5e9   :  { %583 = vmatpush.msra.mxu3 %v556_v20 }
 0x5ea   :  { %v491_v23 = vpop.f32.mrf.mxu1  ;;  %1944 = vmatmul.msk.f32.vlgmr.msra.gmra.mxu3 %vm336_vm11, %v553_v15  ;;  %v1957_v15 = vor.u32 %v2083_v11, %v1954_v14 }
 0x5eb   :  { %v2119_v16 = vpack.i.bf16 %v491_v23, %v488_v9 }
 0x5ed   :  { %2120 = vrot.lane.b32.xlu1 %v2119_v16, %s2357_s17 }
 0x5f0   :  { %v655_v19 = vpop.permute.xlu0 %654 }
 0x5f1   :  { %1950 = vmatpush.msk.msra.mxu1 %vm371_vm13, %v655_v19 }
 0x5f2   :  { %1945 = vmatmul.msk.f32.gmra.mxu3 %vm336_vm11, %v554_v21 }
 0x5f3   :  { %680 = vmatpush.msra.mxu1 %v653_v25 }
 0x5f4   :  { %1951 = vmatmul.msk.f32.vlgmr.msra.gmra.mxu1 %vm336_vm11, %v650_v24 }
 0x5f5   :  { %721 = vrot.lane.b32.xlu1 %v2493_v53, %s2358_s18 }
 0x61b   :  { %v647_v26 = vpop.xlane.xlu0 %646 }
 0x61c   :  { %2204 = vrcp.f32 %v647_v26 }
 0x622   :  { %v2205_v27 = vpop.eup %2204 }
 0x623   :  { %v651_v30 = vmul.f32 %v2205_v27, %v2197_v6  ;;  %v2085_v6 = vld [vmem:[%s2990_s3 + $0x14] sm:$0xf] }
 0x624   :  { %v1961_v8 = vor.u32 %v2085_v6, %v1958_v7 }
 0x625   :  { %1952 = vmatmul.msk.f32.gmra.mxu1 %vm336_vm11, %v651_v30 }
 0x626   :  { %818 = vmatpush.bf16.msrb.mxu3 %v1961_v8 }
 0x62a   :  { %819 = vmatpush.bf16.msrb.mxu3 %v1957_v15 }
 0x65f   :  { %v2121_v53 = vpop.permute.xlu1 %2120 }
 0x660   :  { %v2123_v41 = vunpack.i.h.bf16 %v2121_v53  ;;  %v2122_v33 = vunpack.i.l.bf16 %v2121_v53 }
 0x662   :  { %v713_v44 = vsel %vm302_vm10, %v2587_v13, %v2123_v41  ;;  %v712_v45 = vsel %vm302_vm10, %v2585_v12, %v2122_v33  ;;  %v2152_v13 = vld [vmem:[%s2992_s5 + $0x3] ss:$0 sm:$0xff] }
 0x667   :  { %v722_v39 = vpop.permute.xlu1 %721 }
 0x668   :  { %737 = vmatpush.bf16.msrb.mxu2 %v722_v39  ;;  %v2154_v39 = vld [vmem:[%s2992_s5 + $0x5] ss:$0 sm:$0xff] }
 0x66d   :  { %v585_v49 = vpop.f32.mrf.mxu3 }
 0x671   :  { %v682_v35 = vpop.f32.mrf.mxu1 }
 0x675   :  { %v588_v31 = vpop.f32.mrf.mxu3 }
 0x676   :  { %v2124_v32 = vpack.i.bf16 %v588_v31, %v585_v49 }
 0x678   :  { %2125 = vrot.lane.b32.xlu2 %v2124_v32, %s2359_s19 }
 0x6a2   :  { %v685_v37 = vpop.f32.mrf.mxu1 }
 0x6a3   :  { %v2129_v38 = vpack.i.bf16 %v685_v37, %v682_v35  ;;  %v2153_v35 = vld [vmem:[%s2992_s5 + $0x4] ss:$0 sm:$0xff] }
 0x6a5   :  { %2130 = vrot.lane.b32.xlu0 %v2129_v38, %s2360_s20 }
 0x6d2   :  { %v2126_v40 = vpop.permute.xlu2 %2125 }
 0x6d3   :  { %v2128_v29 = vunpack.i.h.bf16 %v2126_v40  ;;  %v2127_v42 = vunpack.i.l.bf16 %v2126_v40 }
 0x6d5   :  { %v716_v48 = vsel %vm714_vm14, %v713_v44, %v2128_v29  ;;  %v715_v50 = vsel %vm714_vm14, %v712_v45, %v2127_v42  ;;  %v2155_v44 = vld [vmem:[%s2992_s5 + $0x6] ss:$0 sm:$0xff] }
 0x717   :  { %v2131_v43 = vpop.permute.xlu0 %2130 }
 0x718   :  { %v2133_v46 = vunpack.i.h.bf16 %v2131_v43  ;;  %v2132_v47 = vunpack.i.l.bf16 %v2131_v43 }
 0x71a   :  { %v719_v51 = vsel %vm717_vm15, %v716_v48, %v2133_v46  ;;  %v718_v52 = vsel %vm717_vm15, %v715_v50, %v2132_v47 }
 0x71b   :  { %v720_v54 = vpack.c.bf16 %v719_v51, %v718_v52 }
 0x71d   :  { %1953 = vmatmul.msk.bf16.vlgmr.msrb.gmra.mxu2 %vm204_vm1, %v720_v54 }
 0x7a0   :  { %v739_v55 = vpop.f32.mrf.mxu2 }
 0x7a1   :  { %v744_v12 = vadd.f32 %v739_v55, %v2459_v22 }
 0x7a3   :  { %v2648_v56 = vadd.f32 %v2152_v13, %v744_v12 }
 0x7a5   :  { %v749_v57 = vsel %vm204_vm1, %v2648_v56, 0.0 }
 0x7a6   :  { %750 = vadd.xlane.f32.xlu2 %v749_v57 }
 0x7a8   :  { %v741_v58 = vpop.f32.mrf.mxu2 }
 0x7a9   :  { %v745_v59 = vadd.f32 %v741_v58, %v2466_v28 }
 0x7ab   :  { %v2653_v60 = vadd.f32 %v2152_v13, %v745_v59 }
 0x7ad   :  { %v752_v61 = vsel %vm208_vm2, %v2653_v60, 0.0 }
 0x7ae   :  { %753 = vadd.xlane.f32.xlu1 %v752_v61 }
 0x819   :  { %v751_v62 = vpop.xlane.xlu2 %750 }
 0x81a   :  { %v755_v63 = vmul.f32 %v751_v62, %v2470_v36  ;;  %v2090_v62 = vld [vmem:[%s2991_s4 + $0x18] sm:$0xff] }
 0x81b   :  { %938 = vmatpush.bf16.msra.mxu0 %v2090_v62 }
 0x81c   :  { %v757_v22 = vsub.f32 %v2648_v56, %v755_v63 }
 0x81e   :  { %v759_v0 = vmul.f32 %v757_v22, %v757_v22 }
 0x820   :  { %v761_v1 = vsel %vm204_vm1, %v759_v0, 0.0 }
 0x821   :  { %762 = vadd.xlane.f32.xlu0 %v761_v1  ;;  %v754_v2 = vpop.xlane.xlu1 %753 }
 0x822   :  { %v756_v3 = vmul.f32 %v754_v2, %v2470_v36  ;;  %v2089_v2 = vld [vmem:[%s2991_s4 + $0x10] sm:$0xff] }
 0x823   :  { %939 = vmatpush.bf16.msra.mxu0 %v2089_v2 }
 0x824   :  { %v758_v28 = vsub.f32 %v2653_v60, %v756_v3 }
 0x826   :  { %v760_v4 = vmul.f32 %v758_v28, %v758_v28 }
 0x828   :  { %v764_v5 = vsel %vm208_vm2, %v760_v4, 0.0 }
 0x829   :  { %765 = vadd.xlane.f32.xlu2 %v764_v5 }
 0x894   :  { %v763_v9 = vpop.xlane.xlu0 %762 }
 0x895   :  { %v767_v10 = vmul.f32 %v763_v9, %v2470_v36  ;;  %v2088_v9 = vld [vmem:[%s2991_s4 + $0x8] sm:$0xff] }
 0x896   :  { %940 = vmatpush.bf16.msra.mxu0 %v2088_v9 }
 0x897   :  { %v769_v20 = vadd.f32 1e-06, %v767_v10 }
 0x899   :  { %2206 = vrsqrt.f32 %v769_v20  ;;  %vm777_vm4 = vweird.f32 %v769_v20 }
 0x89c   :  { %v766_v23 = vpop.xlane.xlu2 %765 }
 0x89d   :  { %v768_v16 = vmul.f32 %v766_v23, %v2470_v36 }
 0x89f   :  { %v2207_v17 = vpop.eup %2206  ;;  %v770_v18 = vadd.f32 1e-06, %v768_v16 }
 0x8a0   :  { %v772_v19 = vmul.f32 %v2207_v17, %v769_v20  ;;  %vm778_vm3 = vweird.f32 %v2207_v17 }
 0x8a1   :  { %2208 = vrsqrt.f32 %v770_v18  ;;  %vm779_vm5 = vmor %vm777_vm4, %vm778_vm3  ;;  %vm787_vm7 = vweird.f32 %v770_v18 }
 0x8a2   :  { %v773_v21 = vmul.f32 %v2207_v17, %v772_v19 }
 0x8a4   :  { %v774_v24 = vmul.f32 0.5, %v773_v21 }
 0x8a6   :  { %v775_v25 = vsub.f32 1.5, %v774_v24 }
 0x8a7   :  { %v2209_v26 = vpop.eup %2208 }
 0x8a8   :  { %v776_v27 = vmul.f32 %v2207_v17, %v775_v25  ;;  %v782_v30 = vmul.f32 %v2209_v26, %v770_v18  ;;  %vm788_vm6 = vweird.f32 %v2209_v26 }
 0x8a9   :  { %vm789_vm8 = vmor %vm787_vm7, %vm788_vm6 }
 0x8aa   :  { %v783_v49 = vmul.f32 %v2209_v26, %v782_v30  ;;  %v780_v31 = vsel %vm779_vm5, %v2207_v17, %v776_v27  ;;  %v2087_v17 = vld [vmem:[%s2991_s4] sm:$0xff] }
 0x8ab   :  { %v791_v37 = vmul.f32 %v780_v31, %v757_v22  ;;  %941 = vmatpush.bf16.msra.mxu0 %v2087_v17 }
 0x8ac   :  { %v784_v32 = vmul.f32 0.5, %v783_v49 }
 0x8ad   :  { %v794_v40 = vmul.f32 %v2153_v35, %v791_v37 }
 0x8ae   :  { %v785_v34 = vsub.f32 1.5, %v784_v32 }
 0x8af   :  { %v797_v29 = vadd.f32 %v2154_v39, %v794_v40 }
 0x8b0   :  { %v786_v38 = vmul.f32 %v2209_v26, %v785_v34 }
 0x8b2   :  { %v790_v53 = vsel %vm789_vm8, %v2209_v26, %v786_v38 }
 0x8b3   :  { %v792_v41 = vmul.f32 %v790_v53, %v758_v28 }
 0x8b5   :  { %v795_v33 = vmul.f32 %v2153_v35, %v792_v41 }
 0x8b7   :  { %v798_v42 = vadd.f32 %v2154_v39, %v795_v33 }
 0x8b9   :  { %v799_v43 = vpack.c.bf16 %v798_v42, %v797_v29 }
 0x8bb   :  { %1962 = vmatmul.msk.bf16.vlgmr.msrb.gmra.mxu3 %vm204_vm1, %v799_v43 }
 0x93e   :  { %v821_v45 = vpop.f32.mrf.mxu3 }
 0x93f   :  { %v2687_v46 = vadd.f32 %v2155_v44, %v821_v45 }
 0x941   :  { %v2690_v47 = vmul.f32 0.70710677, %v2687_v46 }
 0x943   :  { %v830_v48 = vand.u32 2147483647, %v2690_v47  ;;  %v884_v6 = vmul.f32 %v2690_v47, %v2690_v47 }
 0x945   :  { %v832_v50 = vmul.f32 0.3275911, %v830_v48  ;;  %v886_v15 = vsub.f32 0.0, %v884_v6 }
 0x946   :  { %v823_v51 = vpop.f32.mrf.mxu3 }
 0x947   :  { %v834_v52 = vadd.f32 1.0, %v832_v50  ;;  %v2693_v54 = vadd.f32 %v2155_v44, %v823_v51  ;;  %v888_v24 = vmul.f32 1.442695, %v886_v15 }
 0x949   :  { %2210 = vrcp.f32 %v834_v52  ;;  %v2696_v13 = vmul.f32 0.70710677, %v2693_v54  ;;  %v847_v63 = vand.u32 2147483648, %v834_v52  ;;  %v845_v0 = vand.u32 2147483647, %v834_v52 }
 0x94a   :  { %vm841_vm3 = vweird.f32 %v834_v52  ;;  %v827_v62 = vmul.f32 0.5, %v2693_v54 }
 0x94b   :  { %v831_v55 = vand.u32 2147483647, %v2696_v13  ;;  %v848_v3 = vor.u32 1.1754944e-38, %v847_v63  ;;  %vm846_vm5 = vcmp.eq.f32.partialorder %v845_v0, 8.507059e+37  ;;  %v885_v30 = vmul.f32 %v2696_v13, %v2696_v13 }
 0x94d   :  { %v833_v12 = vmul.f32 0.3275911, %v831_v55  ;;  %v887_v35 = vsub.f32 0.0, %v885_v30 }
 0x94f   :  { %v2211_v57 = vpop.eup %2210  ;;  %v835_v59 = vadd.f32 1.0, %v833_v12  ;;  %v890_v40 = vmul.f32 1.442695, %v887_v35 }
 0x950   :  { %v837_v58 = vmul.f32 %v2211_v57, %v834_v52  ;;  %vm842_vm9 = vweird.f32 %v2211_v57 }
 0x951   :  { %2212 = vrcp.f32 %v835_v59  ;;  %vm843_vm4 = vmor %vm841_vm3, %vm842_vm9  ;;  %v862_v14 = vand.u32 2147483648, %v835_v59  ;;  %v860_v23 = vand.u32 2147483647, %v835_v59  ;;  %vm856_vm7 = vweird.f32 %v835_v59 }
 0x952   :  { %v838_v61 = vsub.f32 1.0, %v837_v58  ;;  %2214 = vpow2.f32 %v888_v24  ;;  %vm896_vm3 = vcmp.ge.f32.partialorder %v2690_v47, 0.0  ;;  %v2156_v47 = vld [vmem:[%s2992_s5 + $0x7] ss:$0 sm:$0xff] }
 0x953   :  { %v863_v21 = vor.u32 1.1754944e-38, %v862_v14  ;;  %vm861_vm9 = vcmp.eq.f32.partialorder %v860_v23, 8.507059e+37  ;;  %2216 = vpow2.f32 %v890_v40  ;;  %v2094_v23 = vld [vmem:[%s2990_s3 + $0x34] sm:$0xf0] }
 0x954   :  { %v839_v22 = vmul.f32 %v2211_v57, %v838_v61  ;;  %v826_v61 = vmul.f32 0.5, %v2687_v46 }
 0x956   :  { %v840_v1 = vadd.f32 %v2211_v57, %v839_v22 }
 0x957   :  { %v2213_v28 = vpop.eup %2212 }
 0x958   :  { %v844_v4 = vsel %vm843_vm4, %v2211_v57, %v840_v1  ;;  %v852_v7 = vmul.f32 %v2213_v28, %v835_v59  ;;  %vm857_vm6 = vweird.f32 %v2213_v28  ;;  %v2215_v41 = vpop.eup %2214  ;;  %vm897_vm4 = vcmp.ge.f32.partialorder %v2696_v13, 0.0 }
 0x959   :  { %v849_v5 = vsel %vm846_vm5, %v848_v3, %v844_v4  ;;  %vm858_vm8 = vmor %vm856_vm7, %vm857_vm6  ;;  %v2217_v51 = vpop.eup %2216 }
 0x95a   :  { %v866_v8 = vmul.f32 1.0614054, %v849_v5  ;;  %v853_v10 = vsub.f32 1.0, %v852_v7 }
 0x95c   :  { %v1963_v11 = vadd.f32 -1.4531521, %v866_v8  ;;  %v854_v20 = vmul.f32 %v2213_v28, %v853_v10 }
 0x95e   :  { %v870_v16 = vmul.f32 %v1963_v11, %v849_v5  ;;  %v855_v18 = vadd.f32 %v2213_v28, %v854_v20  ;;  %v2002_v20 = vld [vmem:[%s2990_s3 + $0x30] sm:$0xf] }
 0x960   :  { %v872_v19 = vadd.f32 1.4214138, %v870_v16  ;;  %v859_v25 = vsel %vm858_vm8, %v2213_v28, %v855_v18  ;;  %v2745_v16 = vor.u32 %v2094_v23, %v2002_v20 }
 0x961   :  { %v864_v27 = vsel %vm861_vm9, %v863_v21, %v859_v25  ;;  %v2092_v21 = vld [vmem:[%s2990_s3 + $0x24] sm:$0xf0] }
 0x962   :  { %v874_v26 = vmul.f32 %v872_v19, %v849_v5  ;;  %v867_v49 = vmul.f32 1.0614054, %v864_v27  ;;  %1048 = vmatpush.bf16.msrb.mxu1 %v2745_v16  ;;  %v1998_v19 = vld [vmem:[%s2990_s3 + $0x20] sm:$0xf] }
 0x963   :  { %v2755_v25 = vor.u32 %v2092_v21, %v1998_v19 }
 0x964   :  { %v1965_v31 = vadd.f32 -0.28449672, %v874_v26  ;;  %v1964_v32 = vadd.f32 -1.4531521, %v867_v49 }
 0x966   :  { %v878_v34 = vmul.f32 %v1965_v31, %v849_v5  ;;  %v871_v37 = vmul.f32 %v1964_v32, %v864_v27  ;;  %1049 = vmatpush.bf16.msrb.mxu1 %v2755_v25 }
 0x968   :  { %v880_v38 = vadd.f32 0.2548296, %v878_v34  ;;  %v873_v53 = vadd.f32 1.4214138, %v871_v37 }
 0x96a   :  { %v882_v39 = vmul.f32 %v880_v38, %v849_v5  ;;  %v875_v33 = vmul.f32 %v873_v53, %v864_v27 }
 0x96c   :  { %v892_v29 = vmul.f32 %v2215_v41, %v882_v39  ;;  %v1966_v42 = vadd.f32 -0.28449672, %v875_v33 }
 0x96e   :  { %v894_v43 = vsub.f32 1.0, %v892_v29  ;;  %v879_v44 = vmul.f32 %v1966_v42, %v864_v27  ;;  %v2157_v29 = vld [vmem:[%s2992_s5 + $0x8] ss:$0 sm:$0xff] }
 0x970   :  { %v881_v45 = vadd.f32 0.2548296, %v879_v44  ;;  %v898_v48 = vsub.f32 0.0, %v894_v43 }
 0x972   :  { %v883_v50 = vmul.f32 %v881_v45, %v864_v27  ;;  %v900_v55 = vsel %vm896_vm3, %v894_v43, %v898_v48  ;;  %v2158_v45 = vld [vmem:[%s2992_s5 + $0x9] ss:$0 sm:$0xff] }
 0x973   :  { %v902_v58 = vadd.f32 1.0, %v900_v55 }
 0x974   :  { %v893_v52 = vmul.f32 %v2217_v51, %v883_v50 }
 0x975   :  { %v904_v22 = vmul.f32 %v902_v58, %v826_v61 }
 0x976   :  { %v895_v12 = vsub.f32 1.0, %v893_v52 }
 0x978   :  { %v899_v57 = vsub.f32 0.0, %v895_v12 }
 0x97a   :  { %v901_v59 = vsel %vm897_vm4, %v895_v12, %v899_v57  ;;  %v2159_v57 = vld [vmem:[%s2992_s5 + $0xa] ss:$0 sm:$0xff] }
 0x97b   :  { %v903_v63 = vadd.f32 1.0, %v901_v59 }
 0x97d   :  { %v905_v0 = vmul.f32 %v903_v63, %v827_v62 }
 0x97f   :  { %v906_v1 = vpack.c.bf16 %v905_v0, %v904_v22 }
 0x981   :  { %1983 = vmatmul.msk.bf16.vlgmr.msra.gmra.mxu0 %vm152_vm0, %v906_v1 }
 0x9fe   :  { %v943_v2 = vpop.f32.mrf.mxu0 }
 0x9ff   :  { %v948_v3 = vadd.f32 %v943_v2, %v2648_v56 }
 0xa01   :  { %v2724_v28 = vadd.f32 %v2156_v47, %v948_v3 }
 0xa03   :  { %v975_v46 = vsel %vm204_vm1, %v2724_v28, 0.0 }
 0xa04   :  { %976 = vadd.xlane.f32.xlu1 %v975_v46 }
 0xa06   :  { %v945_v54 = vpop.f32.mrf.mxu0 }
 0xa07   :  { %v949_v13 = vadd.f32 %v945_v54, %v2653_v60 }
 0xa09   :  { %v2729_v4 = vadd.f32 %v2156_v47, %v949_v13 }
 0xa0b   :  { %v978_v5 = vsel %vm208_vm2, %v2729_v4, 0.0 }
 0xa0c   :  { %979 = vadd.xlane.f32.xlu2 %v978_v5 }
 0xa77   :  { %v977_v6 = vpop.xlane.xlu1 %976 }
 0xa78   :  { %v981_v7 = vmul.f32 %v977_v6, %v2470_v36 }
 0xa7a   :  { %v983_v56 = vsub.f32 %v2724_v28, %v981_v7 }
 0xa7c   :  { %v985_v8 = vmul.f32 %v983_v56, %v983_v56 }
 0xa7e   :  { %v987_v9 = vsel %vm204_vm1, %v985_v8, 0.0 }
 0xa7f   :  { %988 = vadd.xlane.f32.xlu1 %v987_v9  ;;  %v980_v10 = vpop.xlane.xlu2 %979 }
 0xa80   :  { %v982_v11 = vmul.f32 %v980_v10, %v2470_v36 }
 0xa82   :  { %v984_v60 = vsub.f32 %v2729_v4, %v982_v11 }
 0xa84   :  { %v986_v14 = vmul.f32 %v984_v60, %v984_v60 }
 0xa86   :  { %v990_v15 = vsel %vm208_vm2, %v986_v14, 0.0  ;;  %v2276_v14 = vld [vmem:[%s2992_s5 + $0x1f] sm:$0xff] }
 0xa87   :  { %991 = vadd.xlane.f32.xlu0 %v990_v15 }
 0xaf2   :  { %v989_v17 = vpop.xlane.xlu1 %988 }
 0xaf3   :  { %v993_v18 = vmul.f32 %v989_v17, %v2470_v36  ;;  %v2277_v17 = vld [vmem:[%s2992_s5 + $0x27] sm:$0x3] }
 0xaf5   :  { %v995_v24 = vadd.f32 1e-06, %v993_v18 }
 0xaf7   :  { %2218 = vrsqrt.f32 %v995_v24  ;;  %vm1003_vm6 = vweird.f32 %v995_v24 }
 0xafa   :  { %v992_v26 = vpop.xlane.xlu0 %991 }
 0xafb   :  { %v994_v27 = vmul.f32 %v992_v26, %v2470_v36 }
 0xafd   :  { %v2219_v30 = vpop.eup %2218  ;;  %v996_v49 = vadd.f32 1e-06, %v994_v27 }
 0xafe   :  { %v998_v31 = vmul.f32 %v2219_v30, %v995_v24  ;;  %vm1004_vm5 = vweird.f32 %v2219_v30 }
 0xaff   :  { %2220 = vrsqrt.f32 %v996_v49  ;;  %vm1005_vm7 = vmor %vm1003_vm6, %vm1004_vm5  ;;  %vm1013_vm9 = vweird.f32 %v996_v49 }
 0xb00   :  { %v999_v32 = vmul.f32 %v2219_v30, %v998_v31 }
 0xb02   :  { %v1000_v34 = vmul.f32 0.5, %v999_v32 }
 0xb04   :  { %v1001_v35 = vsub.f32 1.5, %v1000_v34 }
 0xb05   :  { %v2221_v37 = vpop.eup %2220 }
 0xb06   :  { %v1002_v38 = vmul.f32 %v2219_v30, %v1001_v35  ;;  %v1008_v53 = vmul.f32 %v2221_v37, %v996_v49  ;;  %vm1014_vm8 = vweird.f32 %v2221_v37 }
 0xb07   :  { %vm1015_vm3 = vmor %vm1013_vm9, %vm1014_vm8 }
 0xb08   :  { %v1009_v39 = vmul.f32 %v2221_v37, %v1008_v53  ;;  %v1006_v40 = vsel %vm1005_vm7, %v2219_v30, %v1002_v38 }
 0xb09   :  { %v1017_v42 = vmul.f32 %v1006_v40, %v983_v56 }
 0xb0a   :  { %v1010_v41 = vmul.f32 0.5, %v1009_v39 }
 0xb0b   :  { %v1020_v48 = vmul.f32 %v2157_v29, %v1017_v42 }
 0xb0c   :  { %v1011_v33 = vsub.f32 1.5, %v1010_v41 }
 0xb0d   :  { %v1023_v52 = vadd.f32 %v2158_v45, %v1020_v48 }
 0xb0e   :  { %v1012_v43 = vmul.f32 %v2221_v37, %v1011_v33 }
 0xb10   :  { %v1016_v44 = vsel %vm1015_vm3, %v2221_v37, %v1012_v43 }
 0xb11   :  { %v1018_v50 = vmul.f32 %v1016_v44, %v984_v60 }
 0xb13   :  { %v1021_v51 = vmul.f32 %v2157_v29, %v1018_v50 }
 0xb15   :  { %v1024_v55 = vadd.f32 %v2158_v45, %v1021_v51 }
 0xb17   :  { %v1025_v12 = vpack.c.bf16 %v1024_v55, %v1023_v52 }
 0xb19   :  { %2004 = vmatmul.msk.bf16.vlgmr.msrb.gmra.mxu1 %vm204_vm1, %v1025_v12 }
 0xb96   :  { %v1051_v58 = vpop.f32.mrf.mxu1 }
 0xb97   :  { %v2769_v59 = vadd.f32 %v2159_v57, %v1051_v58 }
 0xb99   :  { %1060 = vrot.lane.b32.xlu1 %v2769_v59, %s2347_s29  ;;  %v1056_v63 = vmul.f32 0.35355338, %v2769_v59 }
 0xb9e   :  { %v1053_v61 = vpop.f32.mrf.mxu1 }
 0xb9f   :  { %v2773_v62 = vadd.f32 %v2159_v57, %v1053_v61 }
 0xba1   :  { %1161 = vrot.lane.b32.xlu0 %v2773_v62, %s2350_s12  ;;  %1062 = vrot.lane.b32.xlu2 %v2773_v62, %s2347_s29  ;;  %v1057_v22 = vmul.f32 0.35355338, %v2773_v62 }
 0xba2   :  { %1155 = vrot.lane.b32.xlu1 %v1056_v63, %s2348_s30 }
 0xba9   :  { %1258 = vrot.lane.b32.xlu2 %v2773_v62, %s2349_s8  ;;  %1159 = vrot.lane.b32.xlu0 %v2769_v59, %s2350_s12 }
 0xbaa   :  { %1157 = vrot.lane.b32.xlu1 %v1057_v22, %s2348_s30 }
 0xbb1   :  { %1256 = vrot.lane.b32.xlu2 %v2769_v59, %s2349_s8  ;;  %1252 = vrot.lane.b32.xlu0 %v1056_v63, %s2352_s2 }
 0xbb2   :  { %1353 = vrot.lane.b32.xlu1 %v2769_v59, %s2351_s13 }
 0xbb9   :  { %1355 = vrot.lane.b32.xlu2 %v2773_v62, %s2351_s13  ;;  %1254 = vrot.lane.b32.xlu0 %v1057_v22, %s2352_s2 }
 0xbc1   :  { %1349 = vrot.lane.b32.xlu2 %v1056_v63, %s2353_s14  ;;  %1351 = vrot.lane.b32.xlu0 %v1057_v22, %s2353_s14 }
 0xbc9   :  { %1218 = vrot.lane.b32.xlu0 %v2773_v62, %s2354_s1 }
 0xbd1   :  { %1216 = vrot.lane.b32.xlu0 %v2769_v59, %s2354_s1  ;;  %s1785_s1 = sld [smem:[#allocation2]] }
 0xbd9   :  { %1315 = vrot.lane.b32.xlu0 %v2773_v62, %s2355_s15 }
 0xbfb   :  { %v1063_v0 = vpop.permute.xlu2 %1062 }
 0xbfc   :  { %2005 = vmatpush.xpose.msk.msra.mxu2 %vm302_vm10, %v1063_v0 }
 0xc03   :  { %v1259_v1 = vpop.permute.xlu2 %1258 }
 0xc0b   :  { %v1061_v47 = vpop.permute.xlu1 %1060  ;;  %v1257_v2 = vpop.permute.xlu2 %1256 }
 0xc0c   :  { %2006 = vmatpush.xpose.msk.msra.mxu2 %vm302_vm10, %v1061_v47 }
 0xc0f   :  { %2007 = vmatmul.msk.f32.vlgmr.msra.gmra.mxu2 %vm302_vm10, %v1056_v63 }
 0xc10   :  { %2019 = vmatpush.xpose.msk.msrb.mxu2 %vm302_vm10, %v1259_v1 }
 0xc13   :  { %v1162_v3 = vpop.permute.xlu0 %1161  ;;  %v1356_v13 = vpop.permute.xlu2 %1355 }
 0xc14   :  { %2020 = vmatpush.xpose.msk.msrb.mxu2 %vm302_vm10, %v1257_v2  ;;  %v1156_v46 = vpop.permute.xlu1 %1155  ;;  %2012 = vmatpush.xpose.msk.msrb.mxu0 %vm302_vm10, %v1162_v3 }
 0xc17   :  { %2008 = vmatmul.msk.f32.gmra.mxu2 %vm302_vm10, %v1057_v22 }
 0xc1b   :  { %v1160_v54 = vpop.permute.xlu0 %1159  ;;  %v1350_v8 = vpop.permute.xlu2 %1349 }
 0xc1c   :  { %v1158_v5 = vpop.permute.xlu1 %1157  ;;  %2013 = vmatpush.xpose.msk.msrb.mxu0 %vm302_vm10, %v1160_v54 }
 0xc1f   :  { %2014 = vmatmul.msk.f32.vlgmr.msrb.gmra.mxu0 %vm302_vm10, %v1156_v46 }
 0xc20   :  { %2026 = vmatpush.xpose.msk.msra.mxu0 %vm302_vm10, %v1356_v13 }
 0xc23   :  { %v1253_v6 = vpop.permute.xlu0 %1252 }
 0xc24   :  { %v1354_v7 = vpop.permute.xlu1 %1353  ;;  %2021 = vmatmul.msk.f32.vlgmr.msrb.gmra.mxu2 %vm302_vm10, %v1253_v6 }
 0xc25   :  { %2027 = vmatpush.xpose.msk.msra.mxu0 %vm302_vm10, %v1354_v7 }
 0xc27   :  { %2015 = vmatmul.msk.f32.gmra.mxu0 %vm302_vm10, %v1158_v5 }
 0xc2b   :  { %v1255_v56 = vpop.permute.xlu0 %1254 }
 0xc2c   :  { %2022 = vmatmul.msk.f32.gmra.mxu2 %vm302_vm10, %v1255_v56 }
 0xc2f   :  { %2028 = vmatmul.msk.f32.vlgmr.msra.gmra.mxu0 %vm302_vm10, %v1350_v8 }
 0xc33   :  { %v1352_v9 = vpop.permute.xlu0 %1351 }
 0xc37   :  { %2029 = vmatmul.msk.f32.gmra.mxu0 %vm302_vm10, %v1352_v9 }
 0xc3b   :  { %v1219_v10 = vpop.permute.xlu0 %1218 }
 0xc3c   :  { %2016 = vmatpush.msk.msra.mxu1 %vm371_vm13, %v1219_v10 }
 0xc43   :  { %v1217_v11 = vpop.permute.xlu0 %1216 }
 0xc44   :  { %1244 = vmatpush.msra.mxu1 %v1217_v11 }
 0xc4b   :  { %v1316_v42 = vpop.permute.xlu0 %1315 }
 0xc92   :  { %v1091_v60 = vpop.f32.mrf.mxu2 }
 0xc93   :  { %v1092_v15 = vadd.f32 %v2276_v14, %v1091_v60 }
 0xc95   :  { %v1097_v20 = vsel %vm336_vm11, %v1092_v15, -inf }
 0xc96   :  { %1098 = vmax.xlane.f32.xlu1 %v1097_v20 }
 0xc9a   :  { %v1094_v23 = vpop.f32.mrf.mxu2 }
 0xc9b   :  { %v1095_v18 = vadd.f32 %v2277_v17, %v1094_v23 }
 0xc9c   :  { %v1188_v19 = vpop.f32.mrf.mxu0 }
 0xc9d   :  { %v1189_v21 = vadd.f32 %v2276_v14, %v1188_v19  ;;  %v1100_v24 = vsel %vm340_vm12, %v1095_v18, -inf }
 0xc9e   :  { %1101 = vmax.xlane.f32.xlu0 %v1100_v24 }
 0xc9f   :  { %v1194_v26 = vsel %vm336_vm11, %v1189_v21, -inf }
 0xca0   :  { %1195 = vmax.xlane.f32.xlu2 %v1194_v26 }
 0xca4   :  { %v1191_v27 = vpop.f32.mrf.mxu0 }
 0xca5   :  { %v1192_v30 = vadd.f32 %v2277_v17, %v1191_v27 }
 0xca7   :  { %v1197_v49 = vsel %vm340_vm12, %v1192_v30, -inf  ;;  %v1285_v35 = vpop.f32.mrf.mxu2 }
 0xca8   :  { %1198 = vmax.xlane.f32.xlu1 %v1197_v49  ;;  %v1286_v37 = vadd.f32 %v2276_v14, %v1285_v35 }
 0xcaa   :  { %v1291_v38 = vsel %vm336_vm11, %v1286_v37, -inf }
 0xcac   :  { %v1382_v31 = vpop.f32.mrf.mxu0 }
 0xcad   :  { %v1383_v32 = vadd.f32 %v2276_v14, %v1382_v31 }
 0xcaf   :  { %v1388_v34 = vsel %vm336_vm11, %v1383_v32, -inf  ;;  %v1288_v39 = vpop.f32.mrf.mxu2 }
 0xcb0   :  { %1389 = vmax.xlane.f32.xlu0 %v1388_v34  ;;  %v1289_v41 = vadd.f32 %v2277_v17, %v1288_v39 }
 0xcb2   :  { %v1294_v29 = vsel %vm340_vm12, %v1289_v41, -inf }
 0xcb4   :  { %v1385_v53 = vpop.f32.mrf.mxu0 }
 0xcb5   :  { %v1386_v40 = vadd.f32 %v2277_v17, %v1385_v53 }
 0xcb7   :  { %v1391_v33 = vsel %vm340_vm12, %v1386_v40, -inf }
 0xcb8   :  { %1119 = vrot.lane.b32.xlu2 %v2769_v59, %s2346_s28 }
 0xcc1   :  { %1121 = vrot.lane.b32.xlu1 %v2773_v62, %s2346_s28 }
 0xce1   :  { %1292 = vmax.xlane.f32.xlu2 %v1291_v38 }
 0xce9   :  { %1392 = vmax.xlane.f32.xlu2 %v1391_v33 }
 0xceb   :  { %1295 = vmax.xlane.f32.xlu1 %v1294_v29 }
 0xd09   :  { %v1099_v43 = vpop.xlane.xlu1 %1098 }
 0xd0a   :  { %v1103_v44 = vsub.f32 %v1092_v15, %v1099_v43 }
 0xd0c   :  { %v1105_v45 = vmul.f32 1.442695, %v1103_v44 }
 0xd0e   :  { %2222 = vpow2.f32 %v1105_v45 }
 0xd11   :  { %v1102_v48 = vpop.xlane.xlu0 %1101 }
 0xd12   :  { %v1104_v50 = vsub.f32 %v1095_v18, %v1102_v48 }
 0xd13   :  { %v1196_v51 = vpop.xlane.xlu2 %1195 }
 0xd14   :  { %v2223_v52 = vpop.eup %2222  ;;  %v1107_v55 = vmul.f32 1.442695, %v1104_v50  ;;  %v1200_v12 = vsub.f32 %v1189_v21, %v1196_v51 }
 0xd15   :  { %v1109_v57 = vsel %vm336_vm11, %v2223_v52, 0.0 }
 0xd16   :  { %2224 = vpow2.f32 %v1107_v55  ;;  %v1202_v58 = vmul.f32 1.442695, %v1200_v12  ;;  %1110 = vadd.xlane.f32.xlu0 %v1109_v57 }
 0xd18   :  { %2226 = vpow2.f32 %v1202_v58 }
 0xd1b   :  { %v1199_v61 = vpop.xlane.xlu1 %1198  ;;  %v1120_v8 = vpop.permute.xlu2 %1119 }
 0xd1c   :  { %v2225_v63 = vpop.eup %2224  ;;  %v1201_v22 = vsub.f32 %v1192_v30, %v1199_v61 }
 0xd1d   :  { %v1112_v0 = vsel %vm340_vm12, %v2225_v63, 0.0 }
 0xd1e   :  { %v2227_v1 = vpop.eup %2226  ;;  %v1204_v47 = vmul.f32 1.442695, %v1201_v22  ;;  %1113 = vadd.xlane.f32.xlu0 %v1112_v0 }
 0xd1f   :  { %v1206_v2 = vsel %vm336_vm11, %v2227_v1, 0.0 }
 0xd20   :  { %2228 = vpow2.f32 %v1204_v47  ;;  %1207 = vadd.xlane.f32.xlu2 %v1206_v2 }
 0xd23   :  { %v1390_v3 = vpop.xlane.xlu0 %1389 }
 0xd24   :  { %v1394_v46 = vsub.f32 %v1383_v32, %v1390_v3 }
 0xd26   :  { %v2229_v54 = vpop.eup %2228  ;;  %v1396_v13 = vmul.f32 1.442695, %v1394_v46 }
 0xd27   :  { %v1209_v5 = vsel %vm340_vm12, %v2229_v54, 0.0 }
 0xd28   :  { %2230 = vpow2.f32 %v1396_v13  ;;  %1210 = vadd.xlane.f32.xlu1 %v1209_v5 }
 0xd2e   :  { %v2842_v6 = vpop.eup %2230 }
 0xd2f   :  { %v1400_v7 = vsel %vm336_vm11, %v2842_v6, 0.0 }
 0xd30   :  { %1401 = vadd.xlane.f32.xlu0 %v1400_v7 }
 0xd33   :  { %v1122_v56 = vpop.permute.xlu1 %1121 }
 0xd34   :  { %2009 = vmatpush.msk.msra.mxu3 %vm371_vm13, %v1122_v56 }
 0xd36   :  { %1147 = vmatpush.msra.mxu3 %v1120_v8 }
 0xd38   :  { %2023 = vmatpush.msk.msrb.mxu3 %vm371_vm13, %v1316_v42 }
 0xd54   :  { %v1293_v9 = vpop.xlane.xlu2 %1292 }
 0xd55   :  { %v1297_v10 = vsub.f32 %v1286_v37, %v1293_v9 }
 0xd57   :  { %v1299_v11 = vmul.f32 1.442695, %v1297_v10 }
 0xd59   :  { %2232 = vpow2.f32 %v1299_v11 }
 0xd5c   :  { %v1393_v60 = vpop.xlane.xlu2 %1392 }
 0xd5d   :  { %v1395_v14 = vsub.f32 %v1386_v40, %v1393_v60 }
 0xd5e   :  { %v1296_v15 = vpop.xlane.xlu1 %1295 }
 0xd5f   :  { %v2233_v20 = vpop.eup %2232  ;;  %v1398_v23 = vmul.f32 1.442695, %v1395_v14  ;;  %v1298_v17 = vsub.f32 %v1289_v41, %v1296_v15 }
 0xd60   :  { %v1303_v18 = vsel %vm336_vm11, %v2233_v20, 0.0 }
 0xd61   :  { %2234 = vpow2.f32 %v1398_v23  ;;  %v1301_v19 = vmul.f32 1.442695, %v1298_v17  ;;  %1304 = vadd.xlane.f32.xlu2 %v1303_v18 }
 0xd63   :  { %2236 = vpow2.f32 %v1301_v19  ;;  %v2160_v19 = vld [vmem:[%s2992_s5 + $0xb] ss:$0 sm:$0xff] }
 0xd67   :  { %v2235_v21 = vpop.eup %2234 }
 0xd68   :  { %v1403_v24 = vsel %vm340_vm12, %v2235_v21, 0.0 }
 0xd69   :  { %v2237_v26 = vpop.eup %2236  ;;  %1404 = vadd.xlane.f32.xlu0 %v1403_v24 }
 0xd6a   :  { %v1306_v27 = vsel %vm340_vm12, %v2237_v26, 0.0 }
 0xd6b   :  { %1307 = vadd.xlane.f32.xlu1 %v1306_v27 }
 0xd79   :  { %1313 = vrot.lane.b32.xlu2 %v2769_v59, %s2355_s15  ;;  %s2067_s15 = sld [smem:[#allocation2 + $0x1]] }
 0xd7d   :  { %1410 = vrot.lane.b32.xlu0 %v2769_v59, %s2356_s16 }
 0xd81   :  { %1479 = vrot.lane.b32.xlu2 %v2745_v16, %s2358_s18 }
 0xd84   :  { %1412 = vrot.lane.b32.xlu1 %v2773_v62, %s2356_s16 }
 0xd89   :  { %v1111_v30 = vpop.xlane.xlu0 %1110 }
 0xd8a   :  { %2238 = vrcp.f32 %v1111_v30 }
 0xd90   :  { %v2239_v49 = vpop.eup %2238 }
 0xd91   :  { %v1117_v31 = vmul.f32 %v2239_v49, %v2223_v52  ;;  %v1114_v32 = vpop.xlane.xlu0 %1113 }
 0xd92   :  { %2240 = vrcp.f32 %v1114_v32 }
 0xd93   :  { %v1208_v34 = vpop.xlane.xlu2 %1207  ;;  %2010 = vmatmul.msk.f32.vlgmr.msra.gmra.mxu3 %vm336_vm11, %v1117_v31 }
 0xd94   :  { %2242 = vrcp.f32 %v1208_v34 }
 0xd98   :  { %v2241_v35 = vpop.eup %2240 }
 0xd99   :  { %v1118_v37 = vmul.f32 %v2241_v35, %v2225_v63 }
 0xd9a   :  { %v2243_v38 = vpop.eup %2242 }
 0xd9b   :  { %v1214_v59 = vmul.f32 %v2243_v38, %v2227_v1  ;;  %2011 = vmatmul.msk.f32.gmra.mxu3 %vm336_vm11, %v1118_v37  ;;  %v1211_v16 = vpop.xlane.xlu1 %1210 }
 0xd9c   :  { %2244 = vrcp.f32 %v1211_v16 }
 0xd9d   :  { %2017 = vmatmul.msk.f32.vlgmr.msra.gmra.mxu1 %vm336_vm11, %v1214_v59 }
 0xda2   :  { %v2245_v62 = vpop.eup %2244 }
 0xda3   :  { %v1215_v53 = vmul.f32 %v2245_v62, %v2229_v54  ;;  %v1402_v44 = vpop.xlane.xlu0 %1401 }
 0xda5   :  { %2018 = vmatmul.msk.f32.gmra.mxu1 %vm336_vm11, %v1215_v53 }
 0xdd4   :  { %v1305_v39 = vpop.xlane.xlu2 %1304 }
 0xdd5   :  { %2246 = vrcp.f32 %v1305_v39  ;;  %v2093_v39 = vld [vmem:[%s2990_s3 + $0x34] sm:$0xf] }
 0xddb   :  { %v2247_v40 = vpop.eup %2246 }
 0xddc   :  { %v1311_v41 = vmul.f32 %v2247_v40, %v2233_v20  ;;  %v1314_v33 = vpop.permute.xlu2 %1313  ;;  %v1405_v45 = vpop.xlane.xlu0 %1404  ;;  %v2038_v40 = vld [vmem:[%s2990_s3 + $0x38] sm:$0xf0] }
 0xddd   :  { %1341 = vmatpush.msrb.mxu3 %v1314_v33 }
 0xdde   :  { %2024 = vmatmul.msk.f32.vlgmr.msrb.gmra.mxu3 %vm336_vm11, %v1311_v41  ;;  %v1308_v29 = vpop.xlane.xlu1 %1307  ;;  %v2041_v41 = vor.u32 %v2093_v39, %v2038_v40 }
 0xddf   :  { %2248 = vrcp.f32 %v1308_v29 }
 0xde0   :  { %2250 = vrcp.f32 %v1402_v44  ;;  %1574 = vmatpush.bf16.msra.mxu3 %v2041_v41  ;;  %v2096_v41 = vld [vmem:[%s2991_s4 + $0x28] sm:$0xff] }
 0xde1   :  { %2252 = vrcp.f32 %v1405_v45 }
 0xde4   :  { %v1480_v3 = vpop.permute.xlu2 %1479 }
 0xde5   :  { %v2249_v42 = vpop.eup %2248  ;;  %1492 = vmatpush.bf16.msra.mxu2 %v1480_v3  ;;  %v2161_v3 = vld [vmem:[%s2992_s5 + $0xc] ss:$0 sm:$0xff] }
 0xde6   :  { %v1312_v43 = vmul.f32 %v2249_v42, %v2237_v26  ;;  %v2251_v48 = vpop.eup %2250  ;;  %v2091_v42 = vld [vmem:[%s2990_s3 + $0x24] sm:$0xf] }
 0xde7   :  { %v1408_v51 = vmul.f32 %v2251_v48, %v2842_v6  ;;  %v2253_v55 = vpop.eup %2252 }
 0xde8   :  { %2025 = vmatmul.msk.f32.gmra.mxu3 %vm336_vm11, %v1312_v43  ;;  %v1409_v12 = vmul.f32 %v2253_v55, %v2235_v21  ;;  %v2034_v43 = vld [vmem:[%s2990_s3 + $0x28] sm:$0xf0] }
 0xde9   :  { %v2037_v45 = vor.u32 %v2091_v42, %v2034_v43 }
 0xdeb   :  { %1575 = vmatpush.bf16.msra.mxu3 %v2037_v45 }
 0xdef   :  { %v1411_v52 = vpop.permute.xlu0 %1410 }
 0xdf6   :  { %v1413_v50 = vpop.permute.xlu1 %1412 }
 0xdf7   :  { %2030 = vmatpush.msk.msrb.mxu1 %vm371_vm13, %v1413_v50 }
 0xdf9   :  { %1438 = vmatpush.msrb.mxu1 %v1411_v52 }
 0xdfa   :  { %2031 = vmatmul.msk.f32.vlgmr.msrb.gmra.mxu1 %vm336_vm11, %v1408_v51 }
 0xe02   :  { %2032 = vmatmul.msk.f32.gmra.mxu1 %vm336_vm11, %v1409_v12 }
 0xe16   :  { %v1149_v63 = vpop.f32.mrf.mxu3 }
 0xe1a   :  { %v1246_v57 = vpop.f32.mrf.mxu1 }
 0xe1e   :  { %v1152_v22 = vpop.f32.mrf.mxu3 }
 0xe22   :  { %v1249_v58 = vpop.f32.mrf.mxu1 }
 0xe23   :  { %v2134_v61 = vpack.i.bf16 %v1249_v58, %v1246_v57 }
 0xe25   :  { %2135 = vrot.lane.b32.xlu1 %v2134_v61, %s2357_s17 }
 0xe61   :  { %v1343_v0 = vpop.f32.mrf.mxu3 }
 0xe6b   :  { %v1346_v1 = vpop.f32.mrf.mxu3 }
 0xe6c   :  { %v2144_v47 = vpack.i.bf16 %v1346_v1, %v1343_v0 }
 0xe6e   :  { %2145 = vrot.lane.b32.xlu2 %v2144_v47, %s2359_s19 }
 0xe76   :  { %1477 = vrot.lane.b32.xlu2 %v2755_v25, %s2358_s18 }
 0xe77   :  { %v1440_v2 = vpop.f32.mrf.mxu1 }
 0xe7f   :  { %v1443_v46 = vpop.f32.mrf.mxu1 }
 0xe80   :  { %v2139_v54 = vpack.i.bf16 %v1443_v46, %v1440_v2 }
 0xe82   :  { %2140 = vrot.lane.b32.xlu1 %v2139_v54, %s2360_s20  ;;  %s1844_s20 = sshll.u32 %s2994_s7, 4  ;;  %s1831_s7 = sshll.u32 %s2363_s9, 4  ;;  %s1845_s20 = int_to_ptr.hbm [resolvable:$true] %s1844_s20  ;;  %s1832_s7 = int_to_ptr.vmem [resolvable:$true] %s1831_s7 }
 0xe97   :  { %v2136_v6 = vpop.permute.xlu1 %2135 }
 0xe98   :  { %v2138_v7 = vunpack.i.h.bf16 %v2136_v6  ;;  %v2137_v56 = vunpack.i.l.bf16 %v2136_v6 }
 0xe9a   :  { %v1471_v11 = vsel %vm302_vm10, %v1152_v22, %v2138_v7  ;;  %v1470_v25 = vsel %vm302_vm10, %v1149_v63, %v2137_v56 }
 0xec8   :  { %v2146_v13 = vpop.permute.xlu2 %2145 }
 0xec9   :  { %v2148_v8 = vunpack.i.h.bf16 %v2146_v13  ;;  %v2147_v9 = vunpack.i.l.bf16 %v2146_v13 }
 0xecb   :  { %v1472_v15 = vsel %vm714_vm14, %v1470_v25, %v2147_v9  ;;  %v1473_v20 = vsel %vm714_vm14, %v1471_v11, %v2148_v8  ;;  %v2163_v11 = vld [vmem:[%s2992_s5 + $0xe] ss:$0 sm:$0xff] }
 0xed0   :  { %v1478_v5 = vpop.permute.xlu2 %1477 }
 0xed1   :  { %1493 = vmatpush.bf16.msra.mxu2 %v1478_v5  ;;  %v2162_v5 = vld [vmem:[%s2992_s5 + $0xd] ss:$0 sm:$0xff] }
 0xef4   :  { %v2141_v10 = vpop.permute.xlu1 %2140 }
 0xef5   :  { %v2143_v60 = vunpack.i.h.bf16 %v2141_v10  ;;  %v2142_v14 = vunpack.i.l.bf16 %v2141_v10 }
 0xef7   :  { %v1474_v23 = vsel %vm717_vm15, %v1472_v15, %v2142_v14  ;;  %v1475_v17 = vsel %vm717_vm15, %v1473_v20, %v2143_v60 }
 0xef8   :  { %v1476_v18 = vpack.c.bf16 %v1475_v17, %v1474_v23 }
 0xefa   :  { %2033 = vmatmul.msk.bf16.vlgmr.msra.gmra.mxu2 %vm204_vm1, %v1476_v18 }
 0xf7d   :  { %v1495_v21 = vpop.f32.mrf.mxu2 }
 0xf7e   :  { %v1500_v24 = vadd.f32 %v1495_v21, %v2724_v28 }
 0xf80   :  { %v2885_v26 = vadd.f32 %v2160_v19, %v1500_v24 }
 0xf82   :  { %v1505_v27 = vsel %vm204_vm1, %v2885_v26, 0.0 }
 0xf83   :  { %1506 = vadd.xlane.f32.xlu1 %v1505_v27 }
 0xf85   :  { %v1497_v30 = vpop.f32.mrf.mxu2 }
 0xf86   :  { %v1501_v49 = vadd.f32 %v1497_v30, %v2729_v4 }
 0xf88   :  { %v1504_v31 = vadd.f32 %v2160_v19, %v1501_v49 }
 0xf8a   :  { %v1508_v32 = vsel %vm208_vm2, %v1504_v31, 0.0 }
 0xf8b   :  { %1509 = vadd.xlane.f32.xlu0 %v1508_v32  ;;  %v2098_v32 = vld [vmem:[%s2991_s4 + $0x38] sm:$0xff] }
 0xf8c   :  { %1694 = vmatpush.bf16.msrb.mxu0 %v2098_v32 }
 0xff6   :  { %v1507_v34 = vpop.xlane.xlu1 %1506 }
 0xff7   :  { %v1511_v35 = vmul.f32 %v1507_v34, %v2470_v36 }
 0xff9   :  { %v1513_v37 = vsub.f32 %v2885_v26, %v1511_v35 }
 0xffb   :  { %v1515_v38 = vmul.f32 %v1513_v37, %v1513_v37 }
 0xffd   :  { %v1517_v28 = vsel %vm204_vm1, %v1515_v38, 0.0 }
 0xffe   :  { %1518 = vadd.xlane.f32.xlu2 %v1517_v28  ;;  %v1510_v59 = vpop.xlane.xlu0 %1509  ;;  %v2097_v28 = vld [vmem:[%s2991_s4 + $0x30] sm:$0xff] }
 0xfff   :  { %v1512_v16 = vmul.f32 %v1510_v59, %v2470_v36  ;;  %1695 = vmatpush.bf16.msrb.mxu0 %v2097_v28 }
0x1001   :  { %v1514_v62 = vsub.f32 %v1504_v31, %v1512_v16 }
0x1003   :  { %v1516_v53 = vmul.f32 %v1514_v62, %v1514_v62  ;;  %1696 = vmatpush.bf16.msrb.mxu0 %v2096_v41 }
0x1005   :  { %v1520_v4 = vsel %vm208_vm2, %v1516_v53, 0.0 }
0x1006   :  { %1521 = vadd.xlane.f32.xlu1 %v1520_v4 }
0x1071   :  { %v1519_v33 = vpop.xlane.xlu2 %1518 }
0x1072   :  { %v1523_v29 = vmul.f32 %v1519_v33, %v2470_v36 }
0x1074   :  { %v1525_v44 = vadd.f32 1e-06, %v1523_v29 }
0x1076   :  { %2254 = vrsqrt.f32 %v1525_v44  ;;  %vm1533_vm11 = vweird.f32 %v1525_v44 }
0x1079   :  { %v1522_v48 = vpop.xlane.xlu1 %1521 }
0x107a   :  { %v1524_v50 = vmul.f32 %v1522_v48, %v2470_v36 }
0x107c   :  { %v2255_v51 = vpop.eup %2254  ;;  %v1526_v52 = vadd.f32 1e-06, %v1524_v50  ;;  %v2095_v50 = vld [vmem:[%s2991_s4 + $0x20] sm:$0xff] }
0x107d   :  { %v1528_v55 = vmul.f32 %v2255_v51, %v1525_v44  ;;  %vm1534_vm10 = vweird.f32 %v2255_v51  ;;  %1697 = vmatpush.bf16.msrb.mxu0 %v2095_v50 }
0x107e   :  { %2256 = vrsqrt.f32 %v1526_v52  ;;  %vm1535_vm12 = vmor %vm1533_vm11, %vm1534_vm10  ;;  %vm1543_vm14 = vweird.f32 %v1526_v52 }
0x107f   :  { %v1529_v12 = vmul.f32 %v2255_v51, %v1528_v55 }
0x1081   :  { %v1530_v57 = vmul.f32 0.5, %v1529_v12 }
0x1083   :  { %v1531_v58 = vsub.f32 1.5, %v1530_v57 }
0x1084   :  { %v2257_v61 = vpop.eup %2256 }
0x1085   :  { %v1532_v63 = vmul.f32 %v2255_v51, %v1531_v58  ;;  %v1538_v22 = vmul.f32 %v2257_v61, %v1526_v52  ;;  %vm1544_vm13 = vweird.f32 %v2257_v61 }
0x1086   :  { %vm1545_vm15 = vmor %vm1543_vm14, %vm1544_vm13  ;;  %vm1713_vm13 = vcmask 1040384  }
0x1087   :  { %v1539_v0 = vmul.f32 %v2257_v61, %v1538_v22  ;;  %v1536_v1 = vsel %vm1535_vm12, %v2255_v51, %v1532_v63 }
0x1088   :  { %v1547_v46 = vmul.f32 %v1536_v1, %v1513_v37 }
0x1089   :  { %v1540_v47 = vmul.f32 0.5, %v1539_v0 }
0x108a   :  { %v1550_v6 = vmul.f32 %v2161_v3, %v1547_v46 }
0x108b   :  { %v1541_v2 = vsub.f32 1.5, %v1540_v47 }
0x108c   :  { %v1553_v8 = vadd.f32 %v2162_v5, %v1550_v6 }
0x108d   :  { %v1542_v54 = vmul.f32 %v2257_v61, %v1541_v2 }
0x108f   :  { %v1546_v13 = vsel %vm1545_vm15, %v2257_v61, %v1542_v54 }
0x1090   :  { %v1548_v7 = vmul.f32 %v1546_v13, %v1514_v62 }
0x1092   :  { %v1551_v56 = vmul.f32 %v2161_v3, %v1548_v7 }
0x1094   :  { %v1554_v9 = vadd.f32 %v2162_v5, %v1551_v56 }
0x1096   :  { %v1555_v10 = vpack.c.bf16 %v1554_v9, %v1553_v8 }
0x1098   :  { %2042 = vmatmul.msk.bf16.vlgmr.msra.gmra.mxu3 %vm204_vm1, %v1555_v10 }
0x111b   :  { %v1577_v25 = vpop.f32.mrf.mxu3 }
0x111c   :  { %v2920_v60 = vadd.f32 %v2163_v11, %v1577_v25 }
0x111e   :  { %v2923_v14 = vmul.f32 0.70710677, %v2920_v60 }
0x1120   :  { %v1586_v15 = vand.u32 2147483647, %v2923_v14  ;;  %v1640_v4 = vmul.f32 %v2923_v14, %v2923_v14  ;;  %vm1652_vm11 = vcmp.ge.f32.partialorder %v2923_v14, 0.0  ;;  %v2164_v14 = vld [vmem:[%s2992_s5 + $0xf] ss:$0 sm:$0xff] }
0x1122   :  { %v1588_v20 = vmul.f32 0.3275911, %v1586_v15  ;;  %v1642_v43 = vsub.f32 0.0, %v1640_v4 }
0x1123   :  { %v1579_v23 = vpop.f32.mrf.mxu3 }
0x1124   :  { %v1590_v17 = vadd.f32 1.0, %v1588_v20  ;;  %v2926_v18 = vadd.f32 %v2163_v11, %v1579_v23  ;;  %v1644_v12 = vmul.f32 1.442695, %v1642_v43 }
0x1126   :  { %2258 = vrcp.f32 %v1590_v17  ;;  %v2929_v19 = vmul.f32 0.70710677, %v2926_v18  ;;  %v1603_v34 = vand.u32 2147483648, %v1590_v17  ;;  %v1601_v37 = vand.u32 2147483647, %v1590_v17 }
0x1127   :  { %vm1597_vm5 = vweird.f32 %v1590_v17 }
0x1128   :  { %v1587_v21 = vand.u32 2147483647, %v2929_v19  ;;  %v1604_v59 = vor.u32 1.1754944e-38, %v1603_v34  ;;  %vm1602_vm7 = vcmp.eq.f32.partialorder %v1601_v37, 8.507059e+37  ;;  %v1641_v63 = vmul.f32 %v2929_v19, %v2929_v19 }
0x1129   :  { %vm1653_vm12 = vcmp.ge.f32.partialorder %v2929_v19, 0.0 }
0x112a   :  { %v1589_v24 = vmul.f32 0.3275911, %v1587_v21  ;;  %v1643_v2 = vsub.f32 0.0, %v1641_v63  ;;  %v1786_v63 = vstv %s1785_s1 }
0x112c   :  { %v2259_v27 = vpop.eup %2258  ;;  %v1591_v49 = vadd.f32 1.0, %v1589_v24  ;;  %v1646_v5 = vmul.f32 1.442695, %v1643_v2 }
0x112d   :  { %v1593_v30 = vmul.f32 %v2259_v27, %v1590_v17  ;;  %vm1598_vm4 = vweird.f32 %v2259_v27 }
0x112e   :  { %2260 = vrcp.f32 %v1591_v49  ;;  %vm1599_vm6 = vmor %vm1597_vm5, %vm1598_vm4  ;;  %v1618_v42 = vand.u32 2147483648, %v1591_v49  ;;  %v1616_v45 = vand.u32 2147483647, %v1591_v49  ;;  %vm1612_vm9 = vweird.f32 %v1591_v49 }
0x112f   :  { %v1594_v31 = vsub.f32 1.0, %v1593_v30  ;;  %2262 = vpow2.f32 %v1644_v12  ;;  %vm1796_vm4 = vcmask 9217   ;;  %vm1772_vm5 = vcmask 8192  }
0x1130   :  { %v1619_v55 = vor.u32 1.1754944e-38, %v1618_v42  ;;  %vm1617_vm10 = vcmp.eq.f32.partialorder %v1616_v45, 8.507059e+37  ;;  %2264 = vpow2.f32 %v1646_v5 }
0x1131   :  { %v1595_v35 = vmul.f32 %v2259_v27, %v1594_v31  ;;  %v1583_v31 = vmul.f32 0.5, %v2926_v18 }
0x1133   :  { %v1596_v38 = vadd.f32 %v2259_v27, %v1595_v35 }
0x1134   :  { %v2261_v16 = vpop.eup %2260 }
0x1135   :  { %v1600_v62 = vsel %vm1599_vm6, %v2259_v27, %v1596_v38  ;;  %v1608_v39 = vmul.f32 %v2261_v16, %v1591_v49  ;;  %vm1613_vm8 = vweird.f32 %v2261_v16  ;;  %v2263_v6 = vpop.eup %2262  ;;  %v1582_v49 = vmul.f32 0.5, %v2920_v60 }
0x1136   :  { %v1605_v53 = vsel %vm1602_vm7, %v1604_v59, %v1600_v62  ;;  %vm1614_vm3 = vmor %vm1612_vm9, %vm1613_vm8  ;;  %v2265_v20 = vpop.eup %2264  ;;  %vm1768_vm6 = vcmask 9216  }
0x1137   :  { %v1622_v40 = vmul.f32 1.0614054, %v1605_v53  ;;  %v1609_v33 = vsub.f32 1.0, %v1608_v39 }
0x1139   :  { %v2043_v29 = vadd.f32 -1.4531521, %v1622_v40  ;;  %v1610_v44 = vmul.f32 %v2261_v16, %v1609_v33 }
0x113b   :  { %v1626_v48 = vmul.f32 %v2043_v29, %v1605_v53  ;;  %v1611_v51 = vadd.f32 %v2261_v16, %v1610_v44 }
0x113d   :  { %v1628_v52 = vadd.f32 1.4214138, %v1626_v48  ;;  %v1615_v57 = vsel %vm1614_vm3, %v2261_v16, %v1611_v51  ;;  %v2165_v51 = vld [vmem:[%s2992_s5 + $0x1a] ss:$0 sm:$0xff] }
0x113e   :  { %v1620_v61 = vsel %vm1617_vm10, %v1619_v55, %v1615_v57 }
0x113f   :  { %v1630_v58 = vmul.f32 %v1628_v52, %v1605_v53  ;;  %v1623_v22 = vmul.f32 1.0614054, %v1620_v61 }
0x1141   :  { %v2045_v0 = vadd.f32 -0.28449672, %v1630_v58  ;;  %v2044_v1 = vadd.f32 -1.4531521, %v1623_v22  ;;  %v1770_v58 = vlaneseq  ;;  %v2361_v22 = vmov 0.0  }
0x1143   :  { %v1634_v47 = vmul.f32 %v2045_v0, %v1605_v53  ;;  %v1627_v3 = vmul.f32 %v2044_v1, %v1620_v61  ;;  %v2167_v1 = vld [vmem:[%s2992_s5 + $0x1e] ss:$0 sm:$0xff] }
0x1145   :  { %v1636_v46 = vadd.f32 0.2548296, %v1634_v47  ;;  %v1629_v54 = vadd.f32 1.4214138, %v1627_v3  ;;  %v1810_v47 = vstv %s2067_s15 }
0x1147   :  { %v1638_v13 = vmul.f32 %v1636_v46, %v1605_v53  ;;  %v1631_v7 = vmul.f32 %v1629_v54, %v1620_v61 }
0x1149   :  { %v1648_v56 = vmul.f32 %v2263_v6, %v1638_v13  ;;  %v2046_v8 = vadd.f32 -0.28449672, %v1631_v7 }
0x114b   :  { %v1650_v9 = vsub.f32 1.0, %v1648_v56  ;;  %v1635_v10 = vmul.f32 %v2046_v8, %v1620_v61 }
0x114d   :  { %v1637_v11 = vadd.f32 0.2548296, %v1635_v10  ;;  %v1654_v25 = vsub.f32 0.0, %v1650_v9 }
0x114f   :  { %v1639_v15 = vmul.f32 %v1637_v11, %v1620_v61  ;;  %v1656_v17 = vsel %vm1652_vm11, %v1650_v9, %v1654_v25  ;;  %v1771_v61 = vand.u32 127, %v1770_v58 }
0x1150   :  { %v1658_v27 = vadd.f32 1.0, %v1656_v17 }
0x1151   :  { %v1649_v23 = vmul.f32 %v2265_v20, %v1639_v15  ;;  %vm1787_vm15 = vcmp.eq.s32.totalorder %v1771_v61, %v1786_v63  ;;  %vm1811_vm7 = vcmp.eq.s32.totalorder %v1771_v61, %v1810_v47 }
0x1152   :  { %v1660_v34 = vmul.f32 %v1658_v27, %v1582_v49  ;;  %v2066_v0 = vsel %vm1787_vm15, 1.0, %v2361_v22  ;;  %v2068_v13 = vsel %vm1811_vm7, 1.0, %v2361_v22 }
0x1153   :  { %v1651_v21 = vsub.f32 1.0, %v1649_v23 }
0x1155   :  { %v1655_v24 = vsub.f32 0.0, %v1651_v21 }
0x1157   :  { %v1657_v30 = vsel %vm1653_vm12, %v1651_v21, %v1655_v24 }
0x1158   :  { %v1659_v32 = vadd.f32 1.0, %v1657_v30 }
0x115a   :  { %v1661_v35 = vmul.f32 %v1659_v32, %v1583_v31 }
0x115c   :  { %v1662_v37 = vpack.c.bf16 %v1661_v35, %v1660_v34 }
0x115e   :  { %2063 = vmatmul.msk.bf16.vlgmr.msrb.gmra.mxu0 %vm152_vm0, %v1662_v37 }
0x11db   :  { %v1699_v38 = vpop.f32.mrf.mxu0 }
0x11dc   :  { %v1703_v28 = vadd.f32 %v1699_v38, %v2885_v26  ;;  %v1708_v26 = vld [vmem:[%s2992_s5 + $0x1c] sm:$0x3] }
0x11dd   :  { %2064 = vmatpush.xpose.msk.msra.mxu1 %vm204_vm1, %v1708_v26 }
0x11de   :  { %v1705_v59 = vadd.f32 %v2164_v14, %v1703_v28 }
0x11e0   :  { %v1711_v19 = vrot.slane %v1705_v59, 4 }
0x11e2   :  { %v1714_v16 = vsel %vm1713_vm13, %v1705_v59, %v1711_v19 }
0x11e3   :  { %v1701_v60 = vpop.f32.mrf.mxu0  ;;  %v1715_v18 = vsel %vm208_vm2, %v1714_v16, 0.0 }
0x11e4   :  { %1716 = vadd.xlane.f32.xlu0 %v1715_v18 }
0x1257   :  { %v1717_v62 = vpop.xlane.xlu0 %1716 }
0x1258   :  { %v1718_v53 = vmul.f32 %v1717_v62, %v2470_v36 }
0x125a   :  { %v1719_v4 = vsub.f32 %v1714_v16, %v1718_v53 }
0x125c   :  { %v1720_v39 = vmul.f32 %v1719_v4, %v1719_v4 }
0x125e   :  { %v1721_v40 = vsel %vm208_vm2, %v1720_v39, 0.0 }
0x125f   :  { %1722 = vadd.xlane.f32.xlu2 %v1721_v40 }
0x12d2   :  { %v1723_v41 = vpop.xlane.xlu2 %1722 }
0x12d3   :  { %v1724_v33 = vmul.f32 %v1723_v41, %v2470_v36  ;;  %v2166_v36 = vld [vmem:[%s2992_s5 + $0x1b] ss:$0 sm:$0xff]  ;;  %s2362_s5 = smov [#allocation6]  }
0x12d4   :  { %s1842_s18 = sshll.u32 %s2362_s5, 4  ;;  %s1843_s18 = int_to_ptr.vmem [resolvable:$true] %s1842_s18 }
0x12d5   :  { %v1725_v29 = vadd.f32 1e-06, %v1724_v33 }
0x12d7   :  { %2266 = vrsqrt.f32 %v1725_v29  ;;  %vm1732_vm2 = vweird.f32 %v1725_v29 }
0x12dd   :  { %v2267_v42 = vpop.eup %2266 }
0x12de   :  { %v1727_v43 = vmul.f32 %v2267_v42, %v1725_v29  ;;  %vm1733_vm0 = vweird.f32 %v2267_v42 }
0x12df   :  { %vm1734_vm14 = vmor %vm1732_vm2, %vm1733_vm0 }
0x12e0   :  { %v1728_v44 = vmul.f32 %v2267_v42, %v1727_v43 }
0x12e2   :  { %v1729_v45 = vmul.f32 0.5, %v1728_v44 }
0x12e4   :  { %v1730_v48 = vsub.f32 1.5, %v1729_v45 }
0x12e6   :  { %v1731_v50 = vmul.f32 %v2267_v42, %v1730_v48 }
0x12e8   :  { %v1735_v52 = vsel %vm1734_vm14, %v2267_v42, %v1731_v50 }
0x12e9   :  { %v1736_v55 = vmul.f32 %v1735_v52, %v1719_v4 }
0x12eb   :  { %v1738_v12 = vmul.f32 %v2165_v51, %v1736_v55 }
0x12ed   :  { %v1740_v57 = vadd.f32 %v2166_v36, %v1738_v12 }
0x12ef   :  { %2065 = vmatmul.msk.f32.vlgmr.msra.gmra.mxu1 %vm204_vm1, %v1740_v57  ;;  %vm1824_vm1 = vcmask 0  }
0x136c   :  { %v1765_v2 = vpop.f32.mrf.mxu1 }
0x136d   :  { %v1766_v3 = vadd.f32 %v2167_v1, %v1765_v2 }
0x136f   :  { %v1797_v46 = vsel %vm1796_vm4, %v1766_v3, -inf  ;;  %v1773_v54 = vsel %vm1772_vm5, %v1766_v3, -inf  ;;  %1769 = vst.msk [vmem:[#allocation6] sm:$0x3] %vm1768_vm6, %v1766_v3  ;;  %v1814_v5 = vmul.f32 %v2068_v13, %v1766_v3  ;;  %v1790_v17 = vmul.f32 %v2066_v0, %v1766_v3 }
0x1370   :  { %1798 = vmax.xlane.f32.xlu1 %v1797_v46  ;;  %1774 = vmax.xlane.f32.xlu0 %v1773_v54  ;;  %1847 = dma.vmem_to_hbm [thread:$0]  %s1843_s18, 32, %s1845_s20, [#allocation7]  }
0x1371   :  { %v1815_v6 = vsel %vm1796_vm4, %v1814_v5, 0.0  ;;  %v1791_v21 = vsel %vm1772_vm5, %v1790_v17, 0.0 }
0x1378   :  { %1816 = vadd.xlane.f32.xlu0 %v1815_v6 }
0x13e3   :  { %v1799_v7 = vpop.xlane.xlu1 %1798  ;;  %v1775_v56 = vpop.xlane.xlu0 %1774 }
0x13e4   :  { %v1800_v8 = vsub.f32 %v1766_v3, %v1799_v7  ;;  %v1776_v9 = vsub.f32 %v1766_v3, %v1775_v56 }
0x13e6   :  { %v1801_v10 = vmul.f32 1.442695, %v1800_v8  ;;  %v1777_v11 = vmul.f32 1.442695, %v1776_v9 }
0x13e8   :  { %2268 = vpow2.f32 %v1801_v10 }
0x13e9   :  { %2270 = vpow2.f32 %v1777_v11 }
0x13eb   :  { %v1817_v35 = vpop.xlane.xlu0 %1816 }
0x13ee   :  { %v2269_v25 = vpop.eup %2268 }
0x13ef   :  { %v2271_v15 = vpop.eup %2270  ;;  %v1803_v20 = vsel %vm1796_vm4, %v2269_v25, 0.0 }
0x13f0   :  { %1804 = vadd.xlane.f32.xlu2 %v1803_v20  ;;  %v1779_v23 = vsel %vm1772_vm5, %v2271_v15, 0.0 }
0x13f1   :  { %1780 = vadd.xlane.f32.xlu1 %v1779_v23 }
0x13f8   :  { %1792 = vadd.xlane.f32.xlu2 %v1791_v21 }
0x1463   :  { %v1805_v24 = vpop.xlane.xlu2 %1804 }
0x1464   :  { %2272 = vlog2.f32 %v1805_v24  ;;  %v1781_v27 = vpop.xlane.xlu1 %1780 }
0x1465   :  { %2274 = vlog2.f32 %v1781_v27 }
0x146a   :  { %v2273_v30 = vpop.eup %2272 }
0x146b   :  { %v2275_v49 = vpop.eup %2274  ;;  %v1807_v31 = vmul.f32 0.6931472, %v2273_v30  ;;  %v1793_v38 = vpop.xlane.xlu2 %1792 }
0x146c   :  { %v1783_v32 = vmul.f32 0.6931472, %v2275_v49 }
0x146d   :  { %v1808_v34 = vadd.f32 %v1807_v31, %v1799_v7 }
0x146e   :  { %v1784_v37 = vadd.f32 %v1783_v32, %v1775_v56 }
0x146f   :  { %v1818_v14 = vsub.f32 %v1808_v34, %v1817_v35 }
0x1470   :  { %v1794_v28 = vsub.f32 %v1784_v37, %v1793_v38 }
0x1471   :  { %v1820_v59 = vrot.slane %v1818_v14, 1 }
0x1473   :  { %v1822_v19 = vadd.f32 %v1820_v59, %v1794_v28 }
0x1475   :  { %v1823_v16 = vmul.f32 0.5, %v1822_v19 }
0x1477   :  { %1825 = vst.msk [vmem:[#allocation5] sm:$0x1] %vm1824_vm1, %v1823_v16 }
0x1478   :  { %1836 = dma.vmem_to_hbm [thread:$0]  %s1832_s7, 16, %s1834_s11, [#allocation3]  }
0x1479   :  { %2340 = dma.done.wait [#allocation3], 16  }
0x147a   :  { %2341 = vsyncadd [#allocation3], 4294967280 }
0x147b   :  { %2342 = dma.done.wait [#allocation7], 32  }
0x147c   :  { %2343 = vsyncadd [#allocation7], 4294967264 }
0x147d   :  { %1856 = vsyncpa [#allocation3], 1 }
0x147e   :  { %1857 = vsyncpa [#allocation7], 1 }
0x147f   :  { %1858 = vsyncpa [#allocation4], 1 }

</bundles_post_ra>
